<compile_context>
chip_gen: v6e
topology: v6e:2x2x1
jax: 0.10.0
libtpu: 0.0.40
codegen_flags: <defaults>
</compile_context>

<pallas_src>
import functools

import jax
import jax.numpy as jnp
from jax import lax
from jax.experimental import pallas as pl
from jax.experimental.pallas import tpu as pltpu


def _layernorm(x, gamma, beta, eps=1e-5):
    # statistics in f32 (matches torch.nn.LayerNorm, eps=1e-5)
    mean = jnp.mean(x, axis=-1, keepdims=True)
    var = jnp.mean((x - mean) ** 2, axis=-1, keepdims=True)
    return (x - mean) * lax.rsqrt(var + eps) * gamma + beta


def _split_heads(x2d, nhead, hd):
    # (R, E) -> (nhead, R, hd) via static lane slices + stack (safe lowering,
    # done AFTER the full-width projection matmul).
    return jnp.stack([x2d[:, h * hd:(h + 1) * hd] for h in range(nhead)], axis=0)


def encoder_layer_kernel(src_ref, pos_ref,
                         wq_ref, wk_ref, wv_ref, wo_ref,
                         w1_ref, b1_ref, w2_ref, vecs_ref,
                         out_ref,
                         k_sc, v_sc,
                         *, nhead, q_tile):
    f32, bf16 = jnp.float32, jnp.bfloat16
    S, E = src_ref.shape[1], src_ref.shape[2]
    hd = E // nhead
    j = pl.program_id(1)                      # q-tile index (inner grid axis)

    vecs = vecs_ref[...]                      # (16, E) packed f32 vectors
    bq, bk, bv = vecs[0:1], vecs[1:2], vecs[2:3]
    bo, b2 = vecs[3:4], vecs[4:5]
    g1, be1 = vecs[5:6], vecs[6:7]
    g2, be2 = vecs[7:8], vecs[8:9]

    # ---- K / V projections over the full sequence: once per batch element ----
    @pl.when(j == 0)
    def _():
        src = src_ref[0]                                  # (S, E) f32
        xp = (src + pos_ref[0]).astype(bf16)              # q = k = src + pos
        xs = src.astype(bf16)                             # v = src
        k2d = (jnp.dot(xp, wk_ref[...], preferred_element_type=f32) + bk).astype(bf16)
        v2d = (jnp.dot(xs, wv_ref[...], preferred_element_type=f32) + bv).astype(bf16)
        k_sc[...] = _split_heads(k2d, nhead, hd)          # (h, S, hd) bf16
        v_sc[...] = _split_heads(v2d, nhead, hd)

    # ---- this query tile ----
    row0 = pl.multiple_of(j * q_tile, q_tile)
    src_t = src_ref[0, pl.ds(row0, q_tile), :]            # (Tq, E) f32
    pos_t = pos_ref[0, pl.ds(row0, q_tile), :]
    xq = (src_t + pos_t).astype(bf16)

    # Q projection: full lane width; 1/sqrt(hd) folded into wq / bq (exact).
    q2d = (jnp.dot(xq, wq_ref[...], preferred_element_type=f32) + bq).astype(bf16)
    q3 = _split_heads(q2d, nhead, hd)                     # (h, Tq, hd) bf16

    scores = jnp.einsum('hqd,hkd->hqk', q3, k_sc[...],
                        preferred_element_type=f32)       # (h, Tq, S) f32
    m = jnp.max(scores, axis=-1, keepdims=True)
    e = jnp.exp(scores - m)
    p = (e * pl.reciprocal(jnp.sum(e, axis=-1, keepdims=True),
                           approx=True)).astype(bf16)     # softmax, bf16 probs
    pv = jnp.einsum('hqk,hkd->hqd', p, v_sc[...],
                    preferred_element_type=f32)           # (h, Tq, hd) f32

    # concat heads back into one lane-dense (Tq, E) slab, then one full-width
    # (E, E) output projection (no per-head K=hd contraction, no head-sum).
    attn2d = jnp.concatenate([pv[h] for h in range(nhead)], axis=-1).astype(bf16)
    attn = jnp.dot(attn2d, wo_ref[...], preferred_element_type=f32) + bo

    # TODO(synk): dropout / dropout1 / dropout2 are identity (eval mode); no RNG.
    x = src_t + attn
    x = _layernorm(x, g1, be1)

    # feed-forward: linear1 -> relu -> linear2  (bf16 matmuls, f32 accumulate)
    h1 = jnp.maximum(
        jnp.dot(x.astype(bf16), w1_ref[...], preferred_element_type=f32) + b1_ref[...],
        0.0)
    h2 = jnp.dot(h1.astype(bf16), w2_ref[...], preferred_element_type=f32) + b2

    y = _layernorm(x + h2, g2, be2)
    out_ref[0] = y.astype(out_ref.dtype)


def _vmem_limit_bytes():
    # ~75% of physical VMEM (48 MiB on v7x, 96 MiB on v5e/v6e); safe fallback.
    try:
        return int(pltpu.get_tpu_info().vmem_capacity_bytes * 0.75)
    except Exception:
        return 48 * 1024 * 1024


def transformer_encoder_layer(src, pos, params, nhead, *, q_tile=None):
    """src, pos: (B, S, E) float32 (batch-major). Returns (B, S, E) float32.

    Keep activations batch-major across the whole encoder stack; transpose the
    PyTorch (S, B, E) layout once at the model boundary, not per layer.
    """
    B, S, E = src.shape
    assert E % nhead == 0, "d_model must be divisible by nhead"
    hd = E // nhead
    if q_tile is None:
        q_tile = min(S, 128)
    assert S % q_tile == 0 and q_tile % 8 == 0
    # Perf precondition (not correctness): E and dim_feedforward multiples of 128.

    f32, bf16 = jnp.float32, jnp.bfloat16
    scale = 1.0 / (hd ** 0.5)

    ipw, ipb = params["in_proj_weight"], params["in_proj_bias"]
    wq = (ipw[:E] * scale).T.astype(bf16)            # (E, E): x @ Wq.T, scale folded
    wk = ipw[E:2 * E].T.astype(bf16)                 # (E, E)
    wv = ipw[2 * E:].T.astype(bf16)                  # (E, E)
    wo = params["out_proj_weight"].T.astype(bf16)    # (E, E)
    w1 = params["linear1_weight"].T.astype(bf16)     # (E, dff)
    b1 = params["linear1_bias"].reshape(1, -1).astype(f32)
    w2 = params["linear2_weight"].T.astype(bf16)     # (dff, E)
    dff = int(w1.shape[1])

    zeros = jnp.zeros((E,), f32)
    vecs = jnp.stack([
        ipb[:E] * scale,                 # bq (scaled, exact)
        ipb[E:2 * E],                    # bk
        ipb[2 * E:],                     # bv
        params["out_proj_bias"],         # bo
        params["linear2_bias"],          # b2
        params["norm1_weight"], params["norm1_bias"],
        params["norm2_weight"], params["norm2_bias"],
        zeros, zeros, zeros, zeros, zeros, zeros, zeros,
    ], axis=0).astype(f32)               # (16, E): one lane-dense constant DMA

    weights = [wq, wk, wv, wo, w1, b1, w2, vecs]

    flops = B * (8 * S * E * E + 4 * S * S * E + 4 * S * E * dff)
    transcendentals = B * nhead * S * S
    bytes_accessed = (3 * B * S * E * 4                       # src, pos in; out
                      + (4 * E * E + 2 * E * dff) * 2         # bf16 weights
                      + 16 * E * 4 + dff * 4)                 # packed vectors

    def const_spec(w):
        # whole-array block, constant index -> fetched once per grid sweep.
        # TODO(synk): could be single-buffered via pipeline_mode=pl.Buffered(1)
        # to halve resident-weight VMEM on v7x.
        return pl.BlockSpec(w.shape, lambda b, j: (0,) * w.ndim)

    kernel = functools.partial(encoder_layer_kernel, nhead=nhead, q_tile=q_tile)
    return pl.pallas_call(
        kernel,
        out_shape=jax.ShapeDtypeStruct((B, S, E), f32),
        grid=(B, S // q_tile),
        in_specs=[pl.BlockSpec((1, S, E), lambda b, j: (b, 0, 0)),
                  pl.BlockSpec((1, S, E), lambda b, j: (b, 0, 0))]
                 + [const_spec(w) for w in weights],
        out_specs=pl.BlockSpec((1, q_tile, E), lambda b, j: (b, j, 0)),
        scratch_shapes=[pltpu.VMEM((nhead, S, hd), bf16),     # cached K heads
                        pltpu.VMEM((nhead, S, hd), bf16)],    # cached V heads
        compiler_params=pltpu.CompilerParams(
            # batch axis parallel (megacore); q-tile axis carries cached K/V
            # scratch across iterations -> arbitrary.
            dimension_semantics=("parallel", "arbitrary"),
            vmem_limit_bytes=_vmem_limit_bytes()),
        cost_estimate=pl.CostEstimate(flops=flops,
                                      transcendentals=transcendentals,
                                      bytes_accessed=bytes_accessed),
    )(src, pos, *weights)


# ---------------------- pure-JAX f32 reference (for check) ----------------------
def reference(src, pos, params, nhead):
    # src, pos: (B, S, E)
    E = src.shape[-1]
    hd = E // nhead

    def one(src_b, pos_b):  # (S, E)
        S = src_b.shape[0]
        qk = src_b + pos_b
        wq = params["in_proj_weight"][:E]
        wk = params["in_proj_weight"][E:2 * E]
        wv = params["in_proj_weight"][2 * E:]
        q = qk @ wq.T + params["in_proj_bias"][:E]
        k = qk @ wk.T + params["in_proj_bias"][E:2 * E]
        v = src_b @ wv.T + params["in_proj_bias"][2 * E:]
        qh = q.reshape(S, nhead, hd).transpose(1, 0, 2) * (hd ** -0.5)
        kh = k.reshape(S, nhead, hd).transpose(1, 0, 2)
        vh = v.reshape(S, nhead, hd).transpose(1, 0, 2)
        sc = jnp.einsum("hqd,hkd->hqk", qh, kh)
        p = jax.nn.softmax(sc, axis=-1)
        o = jnp.einsum("hqk,hkd->hqd", p, vh).transpose(1, 0, 2).reshape(S, E)
        attn = o @ params["out_proj_weight"].T + params["out_proj_bias"]
        x = src_b + attn
        x = _layernorm(x, params["norm1_weight"], params["norm1_bias"])
        h1 = jnp.maximum(x @ params["linear1_weight"].T + params["linear1_bias"], 0.0)
        h2 = h1 @ params["linear2_weight"].T + params["linear2_bias"]
        y = x + h2
        return _layernorm(y, params["norm2_weight"], params["norm2_bias"])

    return jax.vmap(one)(src, pos)


if __name__ == "__main__":
    # small but lane/sublane-aligned shapes
    S, B, E = 32, 2, 128        # seq, batch, d_model
    NHEAD = 4                   # head_dim = 32
    DFF = 256                   # dim_feedforward
    Q_TILE = 16                 # -> grid (2, 2): exercises megacore + q-tiling

    key = jax.random.PRNGKey(0)
    ks = jax.random.split(key, 12)
    params = {
        "in_proj_weight": jax.random.normal(ks[0], (3 * E, E), jnp.float32) * 0.1,
        "in_proj_bias":   jax.random.normal(ks[1], (3 * E,), jnp.float32) * 0.1,
        "out_proj_weight": jax.random.normal(ks[2], (E, E), jnp.float32) * 0.1,
        "out_proj_bias":   jax.random.normal(ks[3], (E,), jnp.float32) * 0.1,
        "linear1_weight":  jax.random.normal(ks[4], (DFF, E), jnp.float32) * 0.1,
        "linear1_bias":    jax.random.normal(ks[5], (DFF,), jnp.float32) * 0.1,
        "linear2_weight":  jax.random.normal(ks[6], (E, DFF), jnp.float32) * 0.1,
        "linear2_bias":    jax.random.normal(ks[7], (E,), jnp.float32) * 0.1,
        "norm1_weight": jnp.ones((E,), jnp.float32),
        "norm1_bias":   jnp.zeros((E,), jnp.float32),
        "norm2_weight": jnp.ones((E,), jnp.float32),
        "norm2_bias":   jnp.zeros((E,), jnp.float32),
    }

    # PyTorch layout is (S, B, E); transpose ONCE at the model boundary to
    # batch-major and stay batch-major across the whole stack.
    src_sbe = jax.random.normal(ks[8], (S, B, E), jnp.float32)
    pos_sbe = jax.random.normal(ks[9], (S, B, E), jnp.float32)
    src_bse = jnp.transpose(src_sbe, (1, 0, 2))
    pos_bse = jnp.transpose(pos_sbe, (1, 0, 2))

    out = transformer_encoder_layer(src_bse, pos_bse, params, NHEAD, q_tile=Q_TILE)
    out = jax.block_until_ready(out)

    ref = reference(src_bse, pos_bse, params, NHEAD)
    assert out.shape == (B, S, E)
    # bf16 matmul operands with f32 accumulation -> relative Frobenius norm check
    rel_err = jnp.linalg.norm(out - ref) / jnp.linalg.norm(ref)
    assert rel_err < 3e-2, f"mismatch vs JAX reference, rel_err={rel_err}"
    assert bool(jnp.all(jnp.isfinite(out)))

    print("KERNEL_OK")
</pallas_src>

<mosaic_0001>
module attributes {stable_mosaic.version = 11 : i64} {
  func.func @encoder_layer_kernel(%arg0: i32, %arg1: i32, %arg2: memref<1x32x128xf32, #tpu.memory_space<vmem>>, %arg3: memref<1x32x128xf32, #tpu.memory_space<vmem>>, %arg4: memref<128x128xbf16, #tpu.memory_space<vmem>>, %arg5: memref<128x128xbf16, #tpu.memory_space<vmem>>, %arg6: memref<128x128xbf16, #tpu.memory_space<vmem>>, %arg7: memref<128x128xbf16, #tpu.memory_space<vmem>>, %arg8: memref<128x256xbf16, #tpu.memory_space<vmem>>, %arg9: memref<1x256xf32, #tpu.memory_space<vmem>>, %arg10: memref<256x128xbf16, #tpu.memory_space<vmem>>, %arg11: memref<16x128xf32, #tpu.memory_space<vmem>>, %arg12: memref<1x16x128xf32, #tpu.memory_space<vmem>>, %arg13: memref<4x32x32xbf16, #tpu.memory_space<vmem>>, %arg14: memref<4x32x32xbf16, #tpu.memory_space<vmem>>) attributes {dimension_semantics = [#tpu.dimension_semantics<parallel>, #tpu.dimension_semantics<arbitrary>], iteration_bounds = array<i64: 2, 2>, scalar_prefetch = 0 : i64, scratch_operands = 2 : i64, tpu.core_type = #tpu.core_type<tc>, window_params = [{transform_indices = @transform_0, window_bounds = array<i64: 1, 32, 128>}, {transform_indices = @transform_1, window_bounds = array<i64: 1, 32, 128>}, {pipeline_mode = #tpu.pipeline_mode<synchronous>, transform_indices = @transform_2, window_bounds = array<i64: 128, 128>}, {pipeline_mode = #tpu.pipeline_mode<synchronous>, transform_indices = @transform_3, window_bounds = array<i64: 128, 128>}, {pipeline_mode = #tpu.pipeline_mode<synchronous>, transform_indices = @transform_4, window_bounds = array<i64: 128, 128>}, {pipeline_mode = #tpu.pipeline_mode<synchronous>, transform_indices = @transform_5, window_bounds = array<i64: 128, 128>}, {pipeline_mode = #tpu.pipeline_mode<synchronous>, transform_indices = @transform_6, window_bounds = array<i64: 128, 256>}, {pipeline_mode = #tpu.pipeline_mode<synchronous>, transform_indices = @transform_7, window_bounds = array<i64: 1, 256>}, {pipeline_mode = #tpu.pipeline_mode<synchronous>, transform_indices = @transform_8, window_bounds = array<i64: 256, 128>}, {pipeline_mode = #tpu.pipeline_mode<synchronous>, transform_indices = @transform_9, window_bounds = array<i64: 16, 128>}, {transform_indices = @transform_10, window_bounds = array<i64: 1, 16, 128>}]} {
    %c0 = arith.constant 0 : index
    %c0_0 = arith.constant 0 : index
    %0 = vector.load %arg11[%c0, %c0_0] : memref<16x128xf32, #tpu.memory_space<vmem>>, vector<16x128xf32>
    %1 = vector.extract_strided_slice %0 {offsets = [0, 0], sizes = [1, 128], strides = [1, 1]} : vector<16x128xf32> to vector<1x128xf32>
    %2 = vector.extract_strided_slice %0 {offsets = [1, 0], sizes = [1, 128], strides = [1, 1]} : vector<16x128xf32> to vector<1x128xf32>
    %3 = vector.extract_strided_slice %0 {offsets = [2, 0], sizes = [1, 128], strides = [1, 1]} : vector<16x128xf32> to vector<1x128xf32>
    %4 = vector.extract_strided_slice %0 {offsets = [3, 0], sizes = [1, 128], strides = [1, 1]} : vector<16x128xf32> to vector<1x128xf32>
    %5 = vector.extract_strided_slice %0 {offsets = [4, 0], sizes = [1, 128], strides = [1, 1]} : vector<16x128xf32> to vector<1x128xf32>
    %6 = vector.extract_strided_slice %0 {offsets = [5, 0], sizes = [1, 128], strides = [1, 1]} : vector<16x128xf32> to vector<1x128xf32>
    %7 = vector.extract_strided_slice %0 {offsets = [6, 0], sizes = [1, 128], strides = [1, 1]} : vector<16x128xf32> to vector<1x128xf32>
    %8 = vector.extract_strided_slice %0 {offsets = [7, 0], sizes = [1, 128], strides = [1, 1]} : vector<16x128xf32> to vector<1x128xf32>
    %9 = vector.extract_strided_slice %0 {offsets = [8, 0], sizes = [1, 128], strides = [1, 1]} : vector<16x128xf32> to vector<1x128xf32>
    %c0_i32 = arith.constant 0 : i32
    %10 = arith.cmpi eq, %arg1, %c0_i32 : i32
    %11 = arith.extui %10 : i1 to i32
    %c0_i32_1 = arith.constant 0 : i32
    %12 = arith.cmpi ne, %11, %c0_i32_1 : i32
    scf.if %12 {
      %c0_43 = arith.constant 0 : index
      %c0_44 = arith.constant 0 : index
      %c0_45 = arith.constant 0 : index
      %128 = vector.load %arg2[%c0_43, %c0_44, %c0_45] : memref<1x32x128xf32, #tpu.memory_space<vmem>>, vector<1x32x128xf32>
      %129 = vector.shape_cast %128 : vector<1x32x128xf32> to vector<32x128xf32>
      %c0_46 = arith.constant 0 : index
      %c0_47 = arith.constant 0 : index
      %c0_48 = arith.constant 0 : index
      %130 = vector.load %arg3[%c0_46, %c0_47, %c0_48] : memref<1x32x128xf32, #tpu.memory_space<vmem>>, vector<1x32x128xf32>
      %131 = vector.shape_cast %130 : vector<1x32x128xf32> to vector<32x128xf32>
      %132 = arith.addf %129, %131 : vector<32x128xf32>
      %133 = arith.truncf %132 : vector<32x128xf32> to vector<32x128xbf16>
      %134 = arith.truncf %129 : vector<32x128xf32> to vector<32x128xbf16>
      %c0_49 = arith.constant 0 : index
      %c0_50 = arith.constant 0 : index
      %135 = vector.load %arg5[%c0_49, %c0_50] : memref<128x128xbf16, #tpu.memory_space<vmem>>, vector<128x128xbf16>
      %cst_51 = arith.constant dense<0.000000e+00> : vector<32x128xf32>
      %136 = tpu.matmul %133, %135, %cst_51 {dimension_numbers = #tpu.dot_dimension_numbers<[1], [0], [0], [1], [0, 0, 1, 1], [], []>} : vector<32x128xbf16>, vector<128x128xbf16>, vector<32x128xf32> -> vector<32x128xf32>
      %137 = vector.broadcast %2 : vector<1x128xf32> to vector<32x128xf32>
      %138 = arith.addf %136, %137 : vector<32x128xf32>
      %139 = arith.truncf %138 : vector<32x128xf32> to vector<32x128xbf16>
      %c0_52 = arith.constant 0 : index
      %c0_53 = arith.constant 0 : index
      %140 = vector.load %arg6[%c0_52, %c0_53] : memref<128x128xbf16, #tpu.memory_space<vmem>>, vector<128x128xbf16>
      %cst_54 = arith.constant dense<0.000000e+00> : vector<32x128xf32>
      %141 = tpu.matmul %134, %140, %cst_54 {dimension_numbers = #tpu.dot_dimension_numbers<[1], [0], [0], [1], [0, 0, 1, 1], [], []>} : vector<32x128xbf16>, vector<128x128xbf16>, vector<32x128xf32> -> vector<32x128xf32>
      %142 = vector.broadcast %3 : vector<1x128xf32> to vector<32x128xf32>
      %143 = arith.addf %141, %142 : vector<32x128xf32>
      %144 = arith.truncf %143 : vector<32x128xf32> to vector<32x128xbf16>
      %145 = vector.extract_strided_slice %139 {offsets = [0, 0], sizes = [32, 32], strides = [1, 1]} : vector<32x128xbf16> to vector<32x32xbf16>
      %146 = vector.extract_strided_slice %139 {offsets = [0, 32], sizes = [32, 32], strides = [1, 1]} : vector<32x128xbf16> to vector<32x32xbf16>
      %147 = vector.extract_strided_slice %139 {offsets = [0, 64], sizes = [32, 32], strides = [1, 1]} : vector<32x128xbf16> to vector<32x32xbf16>
      %148 = vector.extract_strided_slice %139 {offsets = [0, 96], sizes = [32, 32], strides = [1, 1]} : vector<32x128xbf16> to vector<32x32xbf16>
      %149 = vector.shape_cast %145 : vector<32x32xbf16> to vector<1x32x32xbf16>
      %150 = vector.shape_cast %146 : vector<32x32xbf16> to vector<1x32x32xbf16>
      %151 = vector.shape_cast %147 : vector<32x32xbf16> to vector<1x32x32xbf16>
      %152 = vector.shape_cast %148 : vector<32x32xbf16> to vector<1x32x32xbf16>
      %153 = tpu.concatenate %149, %150, %151, %152 in 0 : vector<1x32x32xbf16>, vector<1x32x32xbf16>, vector<1x32x32xbf16>, vector<1x32x32xbf16> -> vector<4x32x32xbf16>
      %c0_55 = arith.constant 0 : index
      %c0_56 = arith.constant 0 : index
      %c0_57 = arith.constant 0 : index
      %154 = vector.load %arg13[%c0_55, %c0_56, %c0_57] : memref<4x32x32xbf16, #tpu.memory_space<vmem>>, vector<4x32x32xbf16>
      tpu.vector_store %arg13[%c0_55, %c0_56, %c0_57], %153 {strides = array<i32>} : memref<4x32x32xbf16, #tpu.memory_space<vmem>>, vector<4x32x32xbf16>,
      %155 = vector.extract_strided_slice %144 {offsets = [0, 0], sizes = [32, 32], strides = [1, 1]} : vector<32x128xbf16> to vector<32x32xbf16>
      %156 = vector.extract_strided_slice %144 {offsets = [0, 32], sizes = [32, 32], strides = [1, 1]} : vector<32x128xbf16> to vector<32x32xbf16>
      %157 = vector.extract_strided_slice %144 {offsets = [0, 64], sizes = [32, 32], strides = [1, 1]} : vector<32x128xbf16> to vector<32x32xbf16>
      %158 = vector.extract_strided_slice %144 {offsets = [0, 96], sizes = [32, 32], strides = [1, 1]} : vector<32x128xbf16> to vector<32x32xbf16>
      %159 = vector.shape_cast %155 : vector<32x32xbf16> to vector<1x32x32xbf16>
      %160 = vector.shape_cast %156 : vector<32x32xbf16> to vector<1x32x32xbf16>
      %161 = vector.shape_cast %157 : vector<32x32xbf16> to vector<1x32x32xbf16>
      %162 = vector.shape_cast %158 : vector<32x32xbf16> to vector<1x32x32xbf16>
      %163 = tpu.concatenate %159, %160, %161, %162 in 0 : vector<1x32x32xbf16>, vector<1x32x32xbf16>, vector<1x32x32xbf16>, vector<1x32x32xbf16> -> vector<4x32x32xbf16>
      %c0_58 = arith.constant 0 : index
      %c0_59 = arith.constant 0 : index
      %c0_60 = arith.constant 0 : index
      %164 = vector.load %arg14[%c0_58, %c0_59, %c0_60] : memref<4x32x32xbf16, #tpu.memory_space<vmem>>, vector<4x32x32xbf16>
      tpu.vector_store %arg14[%c0_58, %c0_59, %c0_60], %163 {strides = array<i32>} : memref<4x32x32xbf16, #tpu.memory_space<vmem>>, vector<4x32x32xbf16>,
    } else {
    }
    %c16_i32 = arith.constant 16 : i32
    %13 = arith.muli %arg1, %c16_i32 : i32
    %14 = tpu.assume_multiple %13, 16 : i32
    %c0_2 = arith.constant 0 : index
    %15 = arith.index_cast %14 : i32 to index
    %c0_3 = arith.constant 0 : index
    %16 = vector.load %arg2[%c0_2, %15, %c0_3] : memref<1x32x128xf32, #tpu.memory_space<vmem>>, vector<1x16x128xf32>
    %17 = vector.shape_cast %16 : vector<1x16x128xf32> to vector<16x128xf32>
    %c0_4 = arith.constant 0 : index
    %18 = arith.index_cast %14 : i32 to index
    %c0_5 = arith.constant 0 : index
    %19 = vector.load %arg3[%c0_4, %18, %c0_5] : memref<1x32x128xf32, #tpu.memory_space<vmem>>, vector<1x16x128xf32>
    %20 = vector.shape_cast %19 : vector<1x16x128xf32> to vector<16x128xf32>
    %21 = arith.addf %17, %20 : vector<16x128xf32>
    %22 = arith.truncf %21 : vector<16x128xf32> to vector<16x128xbf16>
    %c0_6 = arith.constant 0 : index
    %c0_7 = arith.constant 0 : index
    %23 = vector.load %arg4[%c0_6, %c0_7] : memref<128x128xbf16, #tpu.memory_space<vmem>>, vector<128x128xbf16>
    %cst = arith.constant dense<0.000000e+00> : vector<16x128xf32>
    %24 = tpu.matmul %22, %23, %cst {dimension_numbers = #tpu.dot_dimension_numbers<[1], [0], [0], [1], [0, 0, 1, 1], [], []>} : vector<16x128xbf16>, vector<128x128xbf16>, vector<16x128xf32> -> vector<16x128xf32>
    %25 = vector.broadcast %1 : vector<1x128xf32> to vector<16x128xf32>
    %26 = arith.addf %24, %25 : vector<16x128xf32>
    %27 = arith.truncf %26 : vector<16x128xf32> to vector<16x128xbf16>
    %28 = vector.extract_strided_slice %27 {offsets = [0, 0], sizes = [16, 32], strides = [1, 1]} : vector<16x128xbf16> to vector<16x32xbf16>
    %29 = vector.extract_strided_slice %27 {offsets = [0, 32], sizes = [16, 32], strides = [1, 1]} : vector<16x128xbf16> to vector<16x32xbf16>
    %30 = vector.extract_strided_slice %27 {offsets = [0, 64], sizes = [16, 32], strides = [1, 1]} : vector<16x128xbf16> to vector<16x32xbf16>
    %31 = vector.extract_strided_slice %27 {offsets = [0, 96], sizes = [16, 32], strides = [1, 1]} : vector<16x128xbf16> to vector<16x32xbf16>
    %32 = vector.shape_cast %28 : vector<16x32xbf16> to vector<1x16x32xbf16>
    %33 = vector.shape_cast %29 : vector<16x32xbf16> to vector<1x16x32xbf16>
    %34 = vector.shape_cast %30 : vector<16x32xbf16> to vector<1x16x32xbf16>
    %35 = vector.shape_cast %31 : vector<16x32xbf16> to vector<1x16x32xbf16>
    %36 = tpu.concatenate %32, %33, %34, %35 in 0 : vector<1x16x32xbf16>, vector<1x16x32xbf16>, vector<1x16x32xbf16>, vector<1x16x32xbf16> -> vector<4x16x32xbf16>
    %c0_8 = arith.constant 0 : index
    %c0_9 = arith.constant 0 : index
    %c0_10 = arith.constant 0 : index
    %37 = vector.load %arg13[%c0_8, %c0_9, %c0_10] : memref<4x32x32xbf16, #tpu.memory_space<vmem>>, vector<4x32x32xbf16>
    "tpu.trace_start"() <{level = 10 : i32, message = "hqd,hkd->hqk"}> : () -> ()
    %cst_11 = arith.constant dense<0.000000e+00> : vector<4x16x32xf32>
    %38 = tpu.matmul %36, %37, %cst_11 {dimension_numbers = #tpu.dot_dimension_numbers<[2], [2], [1], [1], [0, 0, 0, 1, 1, 1], [0], [0]>} : vector<4x16x32xbf16>, vector<4x32x32xbf16>, vector<4x16x32xf32> -> vector<4x16x32xf32>
    "tpu.trace_stop"() : () -> ()
    %cst_12 = arith.constant dense<0xFF800000> : vector<4x16xf32>
    %39 = vector.multi_reduction <maximumf>, %38, %cst_12 [2] : vector<4x16x32xf32> to vector<4x16xf32>
    %40 = vector.shape_cast %39 : vector<4x16xf32> to vector<4x16x1xf32>
    %41 = vector.broadcast %40 : vector<4x16x1xf32> to vector<4x16x32xf32>
    %42 = arith.subf %38, %41 : vector<4x16x32xf32>
    %43 = math.exp %42 : vector<4x16x32xf32>
    %cst_13 = arith.constant dense<0.000000e+00> : vector<4x16xf32>
    %44 = vector.multi_reduction <add>, %43, %cst_13 [2] : vector<4x16x32xf32> to vector<4x16xf32>
    %45 = vector.shape_cast %44 : vector<4x16xf32> to vector<4x16x1xf32>
    %46 = tpu.reciprocal %45 {approx = true} : vector<4x16x1xf32> -> vector<4x16x1xf32>
    %47 = vector.broadcast %46 : vector<4x16x1xf32> to vector<4x16x32xf32>
    %48 = arith.mulf %43, %47 : vector<4x16x32xf32>
    %49 = arith.truncf %48 : vector<4x16x32xf32> to vector<4x16x32xbf16>
    %c0_14 = arith.constant 0 : index
    %c0_15 = arith.constant 0 : index
    %c0_16 = arith.constant 0 : index
    %50 = vector.load %arg14[%c0_14, %c0_15, %c0_16] : memref<4x32x32xbf16, #tpu.memory_space<vmem>>, vector<4x32x32xbf16>
    "tpu.trace_start"() <{level = 10 : i32, message = "hqk,hkd->hqd"}> : () -> ()
    %cst_17 = arith.constant dense<0.000000e+00> : vector<4x16x32xf32>
    %51 = tpu.matmul %49, %50, %cst_17 {dimension_numbers = #tpu.dot_dimension_numbers<[2], [1], [1], [2], [0, 0, 0, 1, 1, 2], [0], [0]>} : vector<4x16x32xbf16>, vector<4x32x32xbf16>, vector<4x16x32xf32> -> vector<4x16x32xf32>
    "tpu.trace_stop"() : () -> ()
    %52 = vector.extract_strided_slice %51 {offsets = [0, 0, 0], sizes = [1, 16, 32], strides = [1, 1, 1]} : vector<4x16x32xf32> to vector<1x16x32xf32>
    %53 = vector.shape_cast %52 : vector<1x16x32xf32> to vector<16x32xf32>
    %54 = vector.extract_strided_slice %51 {offsets = [1, 0, 0], sizes = [1, 16, 32], strides = [1, 1, 1]} : vector<4x16x32xf32> to vector<1x16x32xf32>
    %55 = vector.shape_cast %54 : vector<1x16x32xf32> to vector<16x32xf32>
    %56 = vector.extract_strided_slice %51 {offsets = [2, 0, 0], sizes = [1, 16, 32], strides = [1, 1, 1]} : vector<4x16x32xf32> to vector<1x16x32xf32>
    %57 = vector.shape_cast %56 : vector<1x16x32xf32> to vector<16x32xf32>
    %58 = vector.extract_strided_slice %51 {offsets = [3, 0, 0], sizes = [1, 16, 32], strides = [1, 1, 1]} : vector<4x16x32xf32> to vector<1x16x32xf32>
    %59 = vector.shape_cast %58 : vector<1x16x32xf32> to vector<16x32xf32>
    %60 = tpu.concatenate %53, %55, %57, %59 in 1 : vector<16x32xf32>, vector<16x32xf32>, vector<16x32xf32>, vector<16x32xf32> -> vector<16x128xf32>
    %61 = arith.truncf %60 : vector<16x128xf32> to vector<16x128xbf16>
    %c0_18 = arith.constant 0 : index
    %c0_19 = arith.constant 0 : index
    %62 = vector.load %arg7[%c0_18, %c0_19] : memref<128x128xbf16, #tpu.memory_space<vmem>>, vector<128x128xbf16>
    %cst_20 = arith.constant dense<0.000000e+00> : vector<16x128xf32>
    %63 = tpu.matmul %61, %62, %cst_20 {dimension_numbers = #tpu.dot_dimension_numbers<[1], [0], [0], [1], [0, 0, 1, 1], [], []>} : vector<16x128xbf16>, vector<128x128xbf16>, vector<16x128xf32> -> vector<16x128xf32>
    %64 = vector.broadcast %4 : vector<1x128xf32> to vector<16x128xf32>
    %65 = arith.addf %63, %64 : vector<16x128xf32>
    %66 = arith.addf %17, %65 : vector<16x128xf32>
    %cst_21 = arith.constant dense<0.000000e+00> : vector<16xf32>
    %67 = vector.multi_reduction <add>, %66, %cst_21 [1] : vector<16x128xf32> to vector<16xf32>
    %68 = vector.shape_cast %67 : vector<16xf32> to vector<16x1xf32>
    %cst_22 = arith.constant 1.280000e+02 : f32
    %69 = vector.broadcast %cst_22 : f32 to vector<16x1xf32>
    %70 = arith.divf %68, %69 : vector<16x1xf32>
    %71 = vector.broadcast %70 : vector<16x1xf32> to vector<16x128xf32>
    %72 = arith.subf %66, %71 : vector<16x128xf32>
    %73 = arith.mulf %72, %72 : vector<16x128xf32>
    %cst_23 = arith.constant dense<0.000000e+00> : vector<16xf32>
    %74 = vector.multi_reduction <add>, %73, %cst_23 [1] : vector<16x128xf32> to vector<16xf32>
    %75 = vector.shape_cast %74 : vector<16xf32> to vector<16x1xf32>
    %cst_24 = arith.constant 1.280000e+02 : f32
    %76 = vector.broadcast %cst_24 : f32 to vector<16x1xf32>
    %77 = arith.divf %75, %76 : vector<16x1xf32>
    %78 = vector.broadcast %70 : vector<16x1xf32> to vector<16x128xf32>
    %79 = arith.subf %66, %78 : vector<16x128xf32>
    %cst_25 = arith.constant 9.99999974E-6 : f32
    %80 = vector.broadcast %cst_25 : f32 to vector<16x1xf32>
    %81 = arith.addf %77, %80 : vector<16x1xf32>
    %82 = math.rsqrt %81 : vector<16x1xf32>
    %83 = vector.broadcast %82 : vector<16x1xf32> to vector<16x128xf32>
    %84 = arith.mulf %79, %83 : vector<16x128xf32>
    %85 = vector.broadcast %6 : vector<1x128xf32> to vector<16x128xf32>
    %86 = arith.mulf %84, %85 : vector<16x128xf32>
    %87 = vector.broadcast %7 : vector<1x128xf32> to vector<16x128xf32>
    %88 = arith.addf %86, %87 : vector<16x128xf32>
    %89 = arith.truncf %88 : vector<16x128xf32> to vector<16x128xbf16>
    %c0_26 = arith.constant 0 : index
    %c0_27 = arith.constant 0 : index
    %90 = vector.load %arg8[%c0_26, %c0_27] : memref<128x256xbf16, #tpu.memory_space<vmem>>, vector<128x256xbf16>
    %cst_28 = arith.constant dense<0.000000e+00> : vector<16x256xf32>
    %91 = tpu.matmul %89, %90, %cst_28 {dimension_numbers = #tpu.dot_dimension_numbers<[1], [0], [0], [1], [0, 0, 1, 1], [], []>} : vector<16x128xbf16>, vector<128x256xbf16>, vector<16x256xf32> -> vector<16x256xf32>
    %c0_29 = arith.constant 0 : index
    %c0_30 = arith.constant 0 : index
    %92 = vector.load %arg9[%c0_29, %c0_30] : memref<1x256xf32, #tpu.memory_space<vmem>>, vector<1x256xf32>
    %93 = vector.broadcast %92 : vector<1x256xf32> to vector<16x256xf32>
    %94 = arith.addf %91, %93 : vector<16x256xf32>
    %cst_31 = arith.constant 0.000000e+00 : f32
    %95 = vector.broadcast %cst_31 : f32 to vector<16x256xf32>
    %96 = arith.maximumf %94, %95 : vector<16x256xf32>
    %97 = arith.truncf %96 : vector<16x256xf32> to vector<16x256xbf16>
    %c0_32 = arith.constant 0 : index
    %c0_33 = arith.constant 0 : index
    %98 = vector.load %arg10[%c0_32, %c0_33] : memref<256x128xbf16, #tpu.memory_space<vmem>>, vector<256x128xbf16>
    %cst_34 = arith.constant dense<0.000000e+00> : vector<16x128xf32>
    %99 = tpu.matmul %97, %98, %cst_34 {dimension_numbers = #tpu.dot_dimension_numbers<[1], [0], [0], [1], [0, 0, 1, 1], [], []>} : vector<16x256xbf16>, vector<256x128xbf16>, vector<16x128xf32> -> vector<16x128xf32>
    %100 = vector.broadcast %5 : vector<1x128xf32> to vector<16x128xf32>
    %101 = arith.addf %99, %100 : vector<16x128xf32>
    %102 = arith.addf %88, %101 : vector<16x128xf32>
    %cst_35 = arith.constant dense<0.000000e+00> : vector<16xf32>
    %103 = vector.multi_reduction <add>, %102, %cst_35 [1] : vector<16x128xf32> to vector<16xf32>
    %104 = vector.shape_cast %103 : vector<16xf32> to vector<16x1xf32>
    %cst_36 = arith.constant 1.280000e+02 : f32
    %105 = vector.broadcast %cst_36 : f32 to vector<16x1xf32>
    %106 = arith.divf %104, %105 : vector<16x1xf32>
    %107 = vector.broadcast %106 : vector<16x1xf32> to vector<16x128xf32>
    %108 = arith.subf %102, %107 : vector<16x128xf32>
    %109 = arith.mulf %108, %108 : vector<16x128xf32>
    %cst_37 = arith.constant dense<0.000000e+00> : vector<16xf32>
    %110 = vector.multi_reduction <add>, %109, %cst_37 [1] : vector<16x128xf32> to vector<16xf32>
    %111 = vector.shape_cast %110 : vector<16xf32> to vector<16x1xf32>
    %cst_38 = arith.constant 1.280000e+02 : f32
    %112 = vector.broadcast %cst_38 : f32 to vector<16x1xf32>
    %113 = arith.divf %111, %112 : vector<16x1xf32>
    %114 = vector.broadcast %106 : vector<16x1xf32> to vector<16x128xf32>
    %115 = arith.subf %102, %114 : vector<16x128xf32>
    %cst_39 = arith.constant 9.99999974E-6 : f32
    %116 = vector.broadcast %cst_39 : f32 to vector<16x1xf32>
    %117 = arith.addf %113, %116 : vector<16x1xf32>
    %118 = math.rsqrt %117 : vector<16x1xf32>
    %119 = vector.broadcast %118 : vector<16x1xf32> to vector<16x128xf32>
    %120 = arith.mulf %115, %119 : vector<16x128xf32>
    %121 = vector.broadcast %8 : vector<1x128xf32> to vector<16x128xf32>
    %122 = arith.mulf %120, %121 : vector<16x128xf32>
    %123 = vector.broadcast %9 : vector<1x128xf32> to vector<16x128xf32>
    %124 = arith.addf %122, %123 : vector<16x128xf32>
    %c0_40 = arith.constant 0 : index
    %c0_41 = arith.constant 0 : index
    %c0_42 = arith.constant 0 : index
    %125 = vector.load %arg12[%c0_40, %c0_41, %c0_42] : memref<1x16x128xf32, #tpu.memory_space<vmem>>, vector<1x16x128xf32>
    %126 = vector.shape_cast %125 : vector<1x16x128xf32> to vector<16x128xf32>
    %127 = vector.shape_cast %124 : vector<16x128xf32> to vector<1x16x128xf32>
    tpu.vector_store %arg12[%c0_40, %c0_41, %c0_42], %127 {strides = array<i32>} : memref<1x16x128xf32, #tpu.memory_space<vmem>>, vector<1x16x128xf32>,
    return
  }
  func.func @transform_0(%arg0: i32, %arg1: i32) -> (i32, i32, i32) {
    %c0_i32 = arith.constant 0 : i32
    %c0_i32_0 = arith.constant 0 : i32
    %c0_i32_1 = arith.constant 0 : i32
    return %arg0, %c0_i32, %c0_i32_0 : i32, i32, i32
  }
  func.func @transform_1(%arg0: i32, %arg1: i32) -> (i32, i32, i32) {
    %c0_i32 = arith.constant 0 : i32
    %c0_i32_0 = arith.constant 0 : i32
    %c0_i32_1 = arith.constant 0 : i32
    return %arg0, %c0_i32, %c0_i32_0 : i32, i32, i32
  }
  func.func @transform_2(%arg0: i32, %arg1: i32) -> (i32, i32) {
    %c0_i32 = arith.constant 0 : i32
    %c0_i32_0 = arith.constant 0 : i32
    %c0_i32_1 = arith.constant 0 : i32
    return %c0_i32, %c0_i32_0 : i32, i32
  }
  func.func @transform_3(%arg0: i32, %arg1: i32) -> (i32, i32) {
    %c0_i32 = arith.constant 0 : i32
    %c0_i32_0 = arith.constant 0 : i32
    %c0_i32_1 = arith.constant 0 : i32
    return %c0_i32, %c0_i32_0 : i32, i32
  }
  func.func @transform_4(%arg0: i32, %arg1: i32) -> (i32, i32) {
    %c0_i32 = arith.constant 0 : i32
    %c0_i32_0 = arith.constant 0 : i32
    %c0_i32_1 = arith.constant 0 : i32
    return %c0_i32, %c0_i32_0 : i32, i32
  }
  func.func @transform_5(%arg0: i32, %arg1: i32) -> (i32, i32) {
    %c0_i32 = arith.constant 0 : i32
    %c0_i32_0 = arith.constant 0 : i32
    %c0_i32_1 = arith.constant 0 : i32
    return %c0_i32, %c0_i32_0 : i32, i32
  }
  func.func @transform_6(%arg0: i32, %arg1: i32) -> (i32, i32) {
    %c0_i32 = arith.constant 0 : i32
    %c0_i32_0 = arith.constant 0 : i32
    %c0_i32_1 = arith.constant 0 : i32
    return %c0_i32, %c0_i32_0 : i32, i32
  }
  func.func @transform_7(%arg0: i32, %arg1: i32) -> (i32, i32) {
    %c0_i32 = arith.constant 0 : i32
    %c0_i32_0 = arith.constant 0 : i32
    %c0_i32_1 = arith.constant 0 : i32
    return %c0_i32, %c0_i32_0 : i32, i32
  }
  func.func @transform_8(%arg0: i32, %arg1: i32) -> (i32, i32) {
    %c0_i32 = arith.constant 0 : i32
    %c0_i32_0 = arith.constant 0 : i32
    %c0_i32_1 = arith.constant 0 : i32
    return %c0_i32, %c0_i32_0 : i32, i32
  }
  func.func @transform_9(%arg0: i32, %arg1: i32) -> (i32, i32) {
    %c0_i32 = arith.constant 0 : i32
    %c0_i32_0 = arith.constant 0 : i32
    %c0_i32_1 = arith.constant 0 : i32
    return %c0_i32, %c0_i32_0 : i32, i32
  }
  func.func @transform_10(%arg0: i32, %arg1: i32) -> (i32, i32, i32) {
    %c0_i32 = arith.constant 0 : i32
    %c0_i32_0 = arith.constant 0 : i32
    return %arg0, %arg1, %c0_i32 : i32, i32, i32
  }
}

</mosaic_0001>

<bundles_post_ra>
// kernel: tpu_custom_call.1
= control target key start
LH: loop header
LB: loop body
LE: loop exit
PB: predicated region body
PF: predicated region fallthrough
CT: control target
= control target key end

     0   :  { %s4142_s0 = inlined_call_operand.hbm [shape: f32[2,32,128], index: 0, kind: input, shape index: {}]   ;;  %s4143_s1 = inlined_call_operand.hbm [shape: f32[2,32,128], index: 1, kind: input, shape index: {}]   ;;  %s4144_s2 = inlined_call_operand.hbm [shape: bf16[128,128], index: 2, kind: input, shape index: {}]   ;;  %s4145_s3 = inlined_call_operand.hbm [shape: bf16[128,128], index: 3, kind: input, shape index: {}]   ;;  %s4146_s4 = inlined_call_operand.hbm [shape: bf16[128,128], index: 4, kind: input, shape index: {}]   ;;  %s4147_s5 = inlined_call_operand.hbm [shape: bf16[128,128], index: 5, kind: input, shape index: {}]   ;;  %s4148_s6 = inlined_call_operand.hbm [shape: bf16[128,256], index: 6, kind: input, shape index: {}]   ;;  %s4149_s7 = inlined_call_operand.hbm [shape: f32[1,256], index: 7, kind: input, shape index: {}]   ;;  %s4150_s8 = inlined_call_operand.hbm [shape: bf16[256,128], index: 8, kind: input, shape index: {}]   ;;  %s4151_s9 = inlined_call_operand.vmem [shape: f32[16,128], index: 9, kind: input, shape index: {}]   ;;  %s4152_s10 = inlined_call_operand.hbm [shape: f32[2,32,128], index: 10, kind: output, shape index: {}]  }
   0x1   :  { %4167 = sst [smem:[#allocation35_spill]] %s4142_s0 }
   0x2   :  { %4168 = sst [smem:[#allocation36_spill]] %s4144_s2 }
   0x3   :  { %4169 = sst [smem:[#allocation37_spill]] %s4145_s3 }
   0x4   :  { %4170 = sst [smem:[#allocation38_spill]] %s4146_s4 }
   0x5   :  { %4171 = sst [smem:[#allocation39_spill]] %s4147_s5 }
   0x6   :  { %4172 = sst [smem:[#allocation40_spill]] %s4148_s6 }
   0x7   :  { %4173 = sst [smem:[#allocation41_spill]] %s4149_s7 }
   0x8   :  { %4174 = sst [smem:[#allocation42_spill]] %s4150_s8 }
   0x9   :  { %4175 = sst [smem:[#allocation43_spill]] %s4151_s9 }
   0xa   :  { %4176 = sst [smem:[#allocation44_spill]] %s4152_s10 }
   0xb   :  { %15 = vsyncpa [#allocation5], 0 }
   0xc   :  { %17 = vsyncpa [#allocation5 + $0x1], 0 }
   0xd   :  { %18 = vsyncpa [#allocation8], 0 }
   0xe   :  { %20 = vsyncpa [#allocation8 + $0x1], 0 }
   0xf   :  { %21 = vsyncpa [#allocation11], 0 }
  0x10   :  { %22 = vsyncpa [#allocation14], 0 }
  0x11   :  { %23 = vsyncpa [#allocation17], 0 }
  0x12   :  { %24 = vsyncpa [#allocation6], 0 }
  0x13   :  { %26 = vsyncpa [#allocation6 + $0x1], 0  ;;  %s3600_s13 = smov 0   ;;  %s3602_s14 = smov 0  }
  0x14   :  { %s3604_s15 = smov 0   ;;  %s3606_s16 = smov 0  }
  0x15   :  { %s3608_s17 = smov 0   ;;  %s3610_s18 = smov 0  }
  0x16   :  { %s3612_s19 = smov 0   ;;  %s3614_s20 = smov 0  }
  0x17   :  { %s3616_s21 = smov 0   ;;  %s3618_s22 = smov 0  }
  0x18   :  { %s3620_s23 = smov 0  }
  0x19 LB: > { %4177 = sst [smem:[#allocation27_spill]] %s3502_s19  ;;  %s3656_s24 = sadd.s32 4294967295, %s3518_s23   ;;  %s3518_s23 = sphi %s3620_s23, %s32_s23   ;;  %s3514_s22 = sphi %s3618_s22, %s4223_s22   ;;  %s3510_s21 = sphi %s3616_s21, %s4222_s21   ;;  %s3506_s20 = sphi %s3614_s20, %s4231_s20   ;;  %s3502_s19 = sphi %s3612_s19, %s4230_s19   ;;  %s3498_s18 = sphi %s3610_s18, %s4229_s18   ;;  %s3494_s17 = sphi %s3608_s17, %s4228_s17   ;;  %s3490_s16 = sphi %s3606_s16, %s4227_s16   ;;  %s3486_s15 = sphi %s3604_s15, %s4226_s15   ;;  %s3482_s14 = sphi %s3602_s14, %s4225_s14   ;;  %s3478_s13 = sphi %s3600_s13, %s4224_s13  }
  0x1a   : > { %4178 = sst [smem:[#allocation28_spill]] %s3506_s20  ;;  %p2412_p0 = scmp.ge.s32.totalorder %s3518_s23, 1 }
  0x1b   : > { %4179 = sst [smem:[#allocation29_spill]] %s3510_s21  ;;  %p4157_p1 = scmp.eq.s32.totalorder %s3656_s24, 0 }
  0x1c   : > { %4180 = sst [smem:[#allocation30_spill]] %s3514_s22  ;;  %p297_p2 = scmp.lt.s32.totalorder %s3518_s23, 5 }
  0x1d   : > { %s3520_s26 = smov [#allocation9]   ;;  %s3521_s29 = smov [#allocation10]  }
  0x1e   : > { %p3661_p3 = pnand %p2412_p0, %p297_p2  ;;  %s309_s27 = sshll.u32 %s3520_s26, 4  ;;  %s310_s27 = int_to_ptr.vmem [resolvable:$true] %s309_s27 }
  0x1f   : > { %s322_s30 = sshll.u32 %s3521_s29, 4  ;;  %s3522_s11 = smov [#allocation13]   ;;  %s323_s30 = int_to_ptr.vmem [resolvable:$true] %s322_s30 }
  0x20   : > { %s4181_s25 = scalar_select %p3661_p3, 1, 0 }
  0x21   : > { %p2838_p4 = pneg %p3661_p3  ;;  %s348_s12 = sshll.u32 %s3522_s11, 4  ;;  %s349_s12 = int_to_ptr.vmem [resolvable:$true] %s348_s12 }
  0x22   : > { %4182 = sst [smem:[#allocation31_spill]] %s4181_s25  ;;  %s3151_s26 = scalar_lea.vmem %s310_s27, 1024 }
  0x23   : > { %p3669_p5 = pnand %p2838_p4, %p4157_p1  ;;  %p3152_p7 = scmp.ne.s32.totalorder %s310_s27, %s3151_s26 }
  0x24   : > { %p3159_p10 = scmp.lt.s32.totalorder %s310_s27, %s310_s27  ;;  %p3160_p11 = scmp.lt.s32.totalorder %s3151_s26, %s3151_s26 }
  0x25   : > { %p3675_p6 = pneg %p3669_p5 }
  0x26   : > { %p3161_p12 = por %p3160_p11, %p3159_p10 }
  0x27   : > { %p3154_p8 = pnand %p3152_p7, %p3675_p6 }
  0x29   : > { %p3155_p9 = pneg %p3154_p8 }
  0x2b   : > { %p3162_p13 = pnand %p3161_p12, %p3155_p9 }
  0x2d   : > { %3165 = shalt.err (!%p3162_p13)
}
  0x2e   : > { %s3523_s29 = smov 64   ;;  %s3524_s11 = smov 4  }
  0x2f   : > { %s4185_s2 = sld [smem:[#allocation36_spill]]  ;;  %s3177_s9 = scalar_lea.vmem %s323_s30, 1024 }
  0x30   : > { %p3178_p0 = scmp.ne.s32.totalorder %s323_s30, %s3177_s9  ;;  %p3185_p7 = scmp.lt.s32.totalorder %s323_s30, %s323_s30 }
  0x31   : > { %p3186_p8 = scmp.lt.s32.totalorder %s3177_s9, %s3177_s9 }
  0x32   : > { %p3180_p2 = pnand %p3178_p0, %p3675_p6 }
  0x33   : > { %p3187_p9 = por %p3186_p8, %p3185_p7 }
  0x34   : > { %p3181_p4 = pneg %p3180_p2 }
  0x35   : > { %2841 = dma.hbm_to_vmem [thread:$0]  (!%p3669_p5), %s4185_s2, 1024, %s310_s27, [#allocation8], %s3523_s29, %s3523_s29, %s3524_s11  }
  0x36   : > { %p3188_p10 = pnand %p3187_p9, %p3181_p4 }
  0x38   : > { %3191 = shalt.err (!%p3188_p10)
}
  0x39   : > { %s4186_s3 = sld [smem:[#allocation37_spill]]  ;;  %s3203_s19 = scalar_lea.vmem %s349_s12, 1024 }
  0x3a   : > { %p3204_p11 = scmp.ne.s32.totalorder %s349_s12, %s3203_s19  ;;  %p3211_p0 = scmp.lt.s32.totalorder %s349_s12, %s349_s12 }
  0x3b   : > { %p3212_p2 = scmp.lt.s32.totalorder %s3203_s19, %s3203_s19 }
  0x3c   : > { %p3206_p12 = pnand %p3204_p11, %p3675_p6 }
  0x3d   : > { %p3213_p4 = por %p3212_p2, %p3211_p0 }
  0x3e   : > { %p3207_p13 = pneg %p3206_p12 }
  0x3f   : > { %2844 = dma.hbm_to_vmem [thread:$0]  (!%p3669_p5), %s4186_s3, 1024, %s323_s30, [#allocation11], %s3523_s29, %s3523_s29, %s3524_s11  }
  0x40   : > { %p3214_p7 = pnand %p3213_p4, %p3207_p13 }
  0x42   : > { %3217 = shalt.err (!%p3214_p7)
}
  0x43   : > { %s4187_s5 = sld [smem:[#allocation39_spill]]  ;;  %s3525_s25 = smov [#allocation16]  }
  0x44   : > { %s375_s27 = sshll.u32 %s3525_s25, 4  ;;  %s3526_s30 = smov [#allocation12]   ;;  %s376_s27 = int_to_ptr.vmem [resolvable:$true] %s375_s27 }
  0x45   : > { %s335_s26 = sshll.u32 %s3526_s30, 4  ;;  %s3229_s2 = scalar_lea.vmem %s376_s27, 32  ;;  %s336_s26 = int_to_ptr.vmem [resolvable:$true] %s335_s26 }
  0x46   : > { %p3230_p8 = scmp.ne.s32.totalorder %s376_s27, %s3229_s2  ;;  %p3237_p11 = scmp.lt.s32.totalorder %s376_s27, %s376_s27 }
  0x47   : > { %p3238_p12 = scmp.lt.s32.totalorder %s3229_s2, %s3229_s2 }
  0x48   : > { %p3232_p9 = pnand %p3230_p8, %p3675_p6 }
  0x49   : > { %2850 = dma.hbm_to_vmem [thread:$0]  (!%p3669_p5), %s4187_s5, 1024, %s349_s12, [#allocation14], %s3523_s29, %s3523_s29, %s3524_s11  }
  0x4a   : > { %p3233_p10 = pneg %p3232_p9  ;;  %p3239_p13 = por %p3238_p12, %p3237_p11 }
  0x4c   : > { %p3240_p0 = pnand %p3239_p13, %p3233_p10 }
  0x4e   : > { %3243 = shalt.err (!%p3240_p0)
}
  0x4f   : > { %s4188_s7 = sld [smem:[#allocation41_spill]]  ;;  %s3255_s12 = scalar_lea.vmem %s336_s26, 1024 }
  0x50   : > { %p3256_p2 = scmp.ne.s32.totalorder %s336_s26, %s3255_s12  ;;  %p3263_p8 = scmp.lt.s32.totalorder %s336_s26, %s336_s26 }
  0x51   : > { %p3264_p9 = scmp.lt.s32.totalorder %s3255_s12, %s3255_s12 }
  0x52   : > { %p3258_p4 = pnand %p3256_p2, %p3675_p6 }
  0x53   : > { %p3265_p1 = por %p3264_p9, %p3263_p8 }
  0x54   : > { %p3259_p7 = pneg %p3258_p4 }
  0x55   : > { %2856 = dma.hbm_to_vmem [thread:$0]  (!%p3669_p5), %s4188_s7, 32, %s376_s27, [#allocation17]  }
  0x56   : > { %p3266_p3 = pnand %p3265_p1, %p3259_p7 }
  0x58   : > { %3269 = shalt.err (!%p3266_p3)
}
  0x59   : > { %s4189_s4 = sld [smem:[#allocation38_spill]]  ;;  %s3527_s25 = smov [#allocation15]  }
  0x5a   : > { %s361_s27 = sshll.u32 %s3527_s25, 4  ;;  %s362_s27 = int_to_ptr.vmem [resolvable:$true] %s361_s27 }
  0x5b   : > { %s3281_s30 = scalar_lea.vmem %s362_s27, 2048  ;;  %p3289_p1 = scmp.lt.s32.totalorder %s362_s27, %s362_s27 }
  0x5c   : > { %p3282_p10 = scmp.ne.s32.totalorder %s362_s27, %s3281_s30  ;;  %p3290_p3 = scmp.lt.s32.totalorder %s3281_s30, %s3281_s30 }
  0x5e   : > { %p3284_p11 = pnand %p3282_p10, %p3675_p6  ;;  %p3291_p13 = por %p3290_p3, %p3289_p1 }
  0x5f   : > { %2847 = dma.hbm_to_vmem [thread:$0]  (!%p3669_p5), %s4189_s4, 1024, %s336_s26, [#allocation11], %s3523_s29, %s3523_s29, %s3524_s11  }
  0x60   : > { %p3285_p12 = pneg %p3284_p11 }
  0x62   : > { %p3292_p0 = pnand %p3291_p13, %p3285_p12 }
  0x64   : > { %3295 = shalt.err (!%p3292_p0)
}
  0x65   : > { %s4159_s19 = smov 128   ;;  %s4161_s9 = smov 8  }
  0x66   : > { %s4190_s6 = sld [smem:[#allocation40_spill]]  ;;  %s3530_s2 = smov [#allocation18]  }
  0x67   : > { %s385_s20 = sshll.u32 %s3530_s2, 4  ;;  %s386_s20 = int_to_ptr.vmem [resolvable:$true] %s385_s20 }
  0x68   : > { %s3307_s25 = scalar_lea.vmem %s386_s20, 2048  ;;  %p3315_p8 = scmp.lt.s32.totalorder %s386_s20, %s386_s20 }
  0x69   : > { %p3308_p2 = scmp.ne.s32.totalorder %s386_s20, %s3307_s25  ;;  %p3316_p9 = scmp.lt.s32.totalorder %s3307_s25, %s3307_s25 }
  0x6b   : > { %p3310_p4 = pnand %p3308_p2, %p3675_p6  ;;  %p3317_p10 = por %p3316_p9, %p3315_p8 }
  0x6c   : > { %2853 = dma.hbm_to_vmem [thread:$0]  (!%p3669_p5), %s4190_s6, 2048, %s362_s27, [#allocation14], %s4159_s19, %s4159_s19, %s4161_s9  }
  0x6d   : > { %p3311_p7 = pneg %p3310_p4 }
  0x6f   : > { %p3318_p11 = pnand %p3317_p10, %p3311_p7 }
  0x71   : > { %3321 = shalt.err (!%p3318_p11)
}
  0x72   : > { %s4191_s8 = sld [smem:[#allocation42_spill]]  ;;  %s2411_s10 = sadd.s32 4294967294, %s3518_s23  }
  0x73   : > { %s41_s28 = sadd.s32 1, %s3510_s21  ;;  %s44_s26 = sadd.s32 1, %s3514_s22 }
  0x74   : > { %p42_p6 = scmp.ge.s32.totalorder %s41_s28, 2  ;;  %s51_s12 = sadd.s32 1, %s3498_s18 }
  0x75   : > { %p58_p12 = scmp.ne.s32.totalorder %s3498_s18, %s3494_s17  ;;  %p59_p1 = scmp.eq.s32.totalorder %s3518_s23, 0 }
  0x76   : > { %s4233_s28 = smov (%p42_p6, %s41_s28), 0  ;;  %s4235_s26 = smov (!%p42_p6, %s44_s26), %s3514_s22 }
  0x77   : > { %4192 = sst [smem:[#allocation32_spill]] %s4233_s28  ;;  %p3756_p3 = por %p59_p1, %p58_p12 }
  0x78   : > { %2859 = dma.hbm_to_vmem [thread:$0]  (!%p3669_p5), %s4191_s8, 2048, %s386_s20, [#allocation17], %s3523_s29, %s3523_s29, %s3524_s11  }
  0x79   : > { %p64_p5 = scmp.ne.s32.totalorder %s3494_s17, %s3490_s16  ;;  %p46_p13 = scmp.ge.s32.totalorder %s4235_s26, 2 }
  0x7a   : > { %s269_s11 = ssub.s32 %s3510_s21, %s4233_s28  ;;  %p4194_p0 = scmp.eq.s32.totalorder %s3656_s24, 0 }
  0x7b   : > { %s273_s20 = sadd.s32 1, %s3486_s15  ;;  %s4237_s26 = smov (%p46_p13, %s4235_s26), 0 }
  0x7c   : > { %p3766_p2 = por %p4194_p0, %p64_p5  ;;  %4196 = sst [smem:[#allocation33_spill]] %s4237_s26 }
  0x7d   : > { %p283_p4 = scmp.ne.s32.totalorder %s3486_s15, %s3482_s14  ;;  %p284_p7 = scmp.eq.s32.totalorder %s3656_s24, 3 }
  0x7e   : > { %s48_s25 = ssub.s32 %s3514_s22, %s4237_s26  ;;  %p289_p8 = scmp.ne.s32.totalorder %s3482_s14, %s3478_s13 }
  0x7f   : > { %p49_p9 = scmp.eq.s32.totalorder %s48_s25, 0  ;;  %s270_s16 = sor.u32 %s269_s11, %s48_s25 }
  0x80   : > { %p271_p10 = scmp.eq.s32.totalorder %s270_s16, 0  ;;  %p3780_p11 = por %p284_p7, %p283_p4 }
  0x81   : > { %s3785_s27 = scalar_select %p49_p9, %s3498_s18, %s51_s12  }
  0x82   : > { %s3788_s19 = scalar_select %p271_p10, %s3486_s15, %s273_s20  }
  0x83   : > { %4198 = sst [smem:[#allocation34_spill]] %s3785_s27  ;;  %p290_p6 = scmp.eq.s32.totalorder %s2411_s10, 3 }
  0x84   : > { %p2878_p12 = scmp.lt.s32.totalorder %s3518_s23, 4  ;;  %s402_s9 = sand.u32 1, %s3498_s18  }
  0x85   : > { %s2566_s3 = sshll.u32 %s3514_s22, 9  ;;  %p3793_p1 = por %p290_p6, %p289_p8 }
  0x86   : > { %s2421_s5 = sshll.u32 %s402_s9, 5  ;;  %s4200_s0 = sld [smem:[#allocation35_spill]] }
  0x87   : > { %p3802_p5 = pnand %p2878_p12, %p3756_p3  ;;  %s406_s10 = scalar_lea.vmem [#allocation4], %s2421_s5 }
  0x88   : > { %s413_s12 = sshll.u32 %s406_s10, 4  ;;  %s403_s20 = scalar_lea.sflag [#allocation5], %s402_s9  ;;  %s414_s12 = int_to_ptr.vmem [resolvable:$true] %s413_s12 }
  0x89   : > { %p3324_p13 = pneg %p3802_p5  ;;  %s3335_s7 = scalar_lea.vmem %s414_s12, 512 }
  0x8a   : > { %p3336_p0 = scmp.ne.s32.totalorder %s414_s12, %s3335_s7  ;;  %s3531_s6 = smov [#allocation4]  }
  0x8b   : > { %s3340_s29 = sshll.u32 %s3531_s6, 4  ;;  %s3341_s29 = int_to_ptr.vmem [resolvable:$false] %s3340_s29 }
  0x8c   : > { %s412_s25 = scalar_lea.hbm %s4200_s0, %s2566_s3  ;;  %p3338_p4 = pnand %p3336_p0, %p3324_p13 }
  0x8d   : > { %s3342_s11 = scalar_lea.vmem %s3341_s29, 1024  ;;  %p3343_p3 = scmp.lt.s32.totalorder %s414_s12, %s3341_s29 }
  0x8e   : > { %p3339_p7 = pneg %p3338_p4  ;;  %p3344_p8 = scmp.lt.s32.totalorder %s3342_s11, %s3335_s7 }
  0x90   : > { %p3345_p9 = por %p3344_p8, %p3343_p3 }
  0x92   : > { %p3346_p10 = pnand %p3345_p9, %p3339_p7 }
  0x94   : > { %3349 = shalt.err (!%p3346_p10)
}
  0x95   : > { %s4202_s9 = smov 8   ;;  %s4203_s10 = smov 128  }
  0x96   : > { %2863 = dma.hbm_to_vmem [thread:$0]  (!%p3802_p5), %s412_s25, 512, %s414_s12, %s403_s20, %s4203_s10, %s4203_s10, %s4202_s9  }
  0x97   : > { %s433_s26 = scalar_lea.hbm %s4143_s1, %s2566_s3  ;;  %s427_s6 = scalar_lea.vmem [#allocation7], %s2421_s5 }
  0x98   : > { %s434_s28 = sshll.u32 %s427_s6, 4  ;;  %s423_s29 = sand.u32 1, %s3518_s23   ;;  %s435_s28 = int_to_ptr.vmem [resolvable:$true] %s434_s28 }
  0x99   : > { %s424_s7 = scalar_lea.sflag [#allocation8], %s423_s29  ;;  %s3363_s11 = scalar_lea.vmem %s435_s28, 512 }
  0x9a   : > { %p3364_p6 = scmp.ne.s32.totalorder %s435_s28, %s3363_s11  ;;  %s3532_s22 = smov [#allocation7]  }
  0x9b   : > { %s3368_s21 = sshll.u32 %s3532_s22, 4  ;;  %s3369_s21 = int_to_ptr.vmem [resolvable:$false] %s3368_s21 }
  0x9c   : > { %p3366_p12 = pnand %p3364_p6, %p3324_p13  ;;  %s3370_s27 = scalar_lea.vmem %s3369_s21, 1024 }
  0x9d   : > { %p3371_p4 = scmp.lt.s32.totalorder %s435_s28, %s3369_s21  ;;  %p3372_p7 = scmp.lt.s32.totalorder %s3370_s27, %s3363_s11 }
  0x9e   : > { %p3367_p0 = pneg %p3366_p12 }
  0x9f   : > { %p3373_p3 = por %p3372_p7, %p3371_p4 }
  0xa1   : > { %p3374_p8 = pnand %p3373_p3, %p3367_p0 }
  0xa3   : > { %3377 = shalt.err (!%p3374_p8)
}
  0xa4   : > { %2866 = dma.hbm_to_vmem [thread:$0]  (!%p3802_p5), %s433_s26, 512, %s435_s28, %s424_s7, %s4203_s10, %s4203_s10, %s4202_s9  }
  0xa5   : > { %s4204_s0 = sld [smem:[#allocation31_spill]] }
  0xab   : > { %p4205_p9 = scmp.ne.s32.totalorder %s4204_s0, 0 }
  0xac   : > { %s448_s3 = sand.u32 (!%p4205_p9), 1, %s3494_s17  }
  0xad   : > { %446 = sbr.rel (%p4205_p9) target bundleno = 3033 (0xbd9), region = 60  ;;  %s2428_s5 = sshll.u32 (!%p4205_p9), %s448_s3, 5 }
  0xae   : > { %s449_s8 = scalar_lea.sflag (!%p4205_p9), [#allocation5], %s448_s3  ;;  %s3831_s22 = scalar_lea.vmem (!%p4205_p9), [#allocation4], %s2428_s5 }
  0xb2   : > { %3449 = dma.done.wait (%p3766_p2), %s449_s8, 512  }
  0xb3   : > { %3451 = vsyncadd (%p3766_p2), %s449_s8, 4294966784  ;;  %s457_s21 = sand.u32 1, %s3656_s24   ;;  %s3838_s28 = scalar_lea.vmem [#allocation7], %s2428_s5 }
  0xb4   : > { %s458_s27 = scalar_lea.sflag [#allocation8], %s457_s21 }
  0xb5   : > { %3453 = dma.done.wait (%p3766_p2), %s458_s27, 512  }
  0xb6   : > { %3455 = vsyncadd (%p3766_p2), %s458_s27, 4294966784  ;;  %p4206_p5 = scmp.eq.s32.totalorder %s3656_s24, 0 }
  0xb8   : > { %3457 = dma.done.wait (%p4206_p5), [#allocation8], 1024   ;;  %p4207_p13 = pmov %p4206_p5 }
  0xb9   : > { %p4208_p10 = pmov %p4206_p5 }
  0xba   : > { %3459 = vsyncadd (%p4207_p13), [#allocation8], 4294966272 }
  0xbb   : > { %3461 = dma.done.wait (%p4208_p10), [#allocation11], 2048   ;;  %p4209_p6 = pmov %p4206_p5 }
  0xbc   : > { %p4210_p12 = pmov %p4206_p5 }
  0xbd   : > { %3463 = vsyncadd (%p4209_p6), [#allocation11], 4294965248 }
  0xbe   : > { %3465 = dma.done.wait (%p4210_p12), [#allocation14], 3072   ;;  %p4211_p0 = pmov %p4206_p5 }
  0xc0   : > { %3467 = vsyncadd (%p4211_p0), [#allocation14], 4294964224  ;;  %p4212_p2 = pmov %p4211_p0 }
  0xc1   : > { %p4213_p4 = pmov %p4211_p0 }
  0xc2   : > { %3469 = dma.done.wait (%p4212_p2), [#allocation17], 2080  }
  0xc3   : > { %3471 = vsyncadd (%p4213_p4), [#allocation17], 4294965216  ;;  %s528_s26 = sand.u32 1, %s3482_s14   ;;  %s4214_s12 = sld [smem:[#allocation43_spill]] }
  0xc4   : > { %s2437_s2 = sshll.u32 %s528_s26, 4  ;;  %s4215_s6 = sld [smem:[#allocation27_spill]] }
  0xc5   : > { %s3873_s10 = scalar_lea.vmem [#allocation19], %s2437_s2 }
  0xc9   : > { %v3866_v0 = vld [vmem:[%s4214_s12] sm:$0xff]  ;;  %v3871_v1 = vld [vmem:[%s4214_s12 + $0x8] sm:$0xff] }
  0xca   : > { %p2438_p7 = scmp.ne.s32.totalorder %s4215_s6, 0 }
  0xcb   : > { %s3533_s24 = smov (!%p2438_p7), 64   ;;  %s3534_s29 = smov (!%p2438_p7), 96  }
  0xcc   : > { %538 = sbr.rel (%p2438_p7) target bundleno = 582 (0x246), region = 100  ;;  %s3535_s7 = smov (!%p2438_p7), 32  }
  0xd1   : > { %v2997_v2 = vld [vmem:[#allocation10 + $0x38] sm:$0xff]   ;;  %v2999_v4 = vld [vmem:[#allocation10 + $0x30] sm:$0xff]   ;;  %v3001_v6 = vld [vmem:[#allocation10 + $0x28] sm:$0xff]   ;;  %v571_v34 = vlaneseq  ;;  %vm855_vm0 = vcmask 257024  }
  0xd2   : > { %v2998_v3 = vld [vmem:[#allocation12 + $0x38] sm:$0xff]   ;;  %2660 = vmatprep.subr.bf16.mxu0 %v2997_v2  ;;  %v3000_v5 = vld [vmem:[#allocation12 + $0x30] sm:$0xff]   ;;  %v3002_v7 = vld [vmem:[#allocation12 + $0x28] sm:$0xff]  }
  0xd3   : > { %2661 = vmatpush3.bf16.msra.mxu0 %v2997_v2  ;;  %2680 = vmatprep.subr.bf16.mxu1 %v2998_v3  ;;  %v3003_v8 = vld [vmem:[#allocation10 + $0x20] sm:$0xff]   ;;  %v3005_v10 = vld [vmem:[#allocation10 + $0x18] sm:$0xff]   ;;  %v3007_v12 = vld [vmem:[#allocation10 + $0x10] sm:$0xff]   ;;  %v572_v35 = vshrl.u32 %v571_v34, 7 }
  0xd4   : > { %2681 = vmatpush3.bf16.msra.mxu1 %v2998_v3  ;;  %2662 = vmatprep.subr.bf16.mxu0 %v2999_v4  ;;  %v3004_v9 = vld [vmem:[#allocation12 + $0x20] sm:$0xff]   ;;  %v3006_v11 = vld [vmem:[#allocation12 + $0x18] sm:$0xff]   ;;  %v540_v14 = vld [vmem:[%s3831_s22 + $0x8] sm:$0xff] }
  0xd5   : > { %2682 = vmatprep.subr.bf16.mxu1 %v3000_v5  ;;  %v539_v13 = vld [vmem:[%s3831_s22] sm:$0xff]  ;;  %v3008_v16 = vld [vmem:[#allocation12 + $0x10] sm:$0xff]   ;;  %v544_v17 = vld [vmem:[%s3838_s28 + $0x8] sm:$0xff]  ;;  %v573_v36 = vsub.s32 1, %v572_v35  ;;  %v692_v37 = vsub.s32 2, %v572_v35 }
  0xd6   : > { %v543_v15 = vld [vmem:[%s3838_s28] sm:$0xff]  ;;  %v553_v19 = vpack.c.bf16 %v540_v14, %v539_v13  ;;  %v548_v20 = vadd.f32 %v544_v17, %v540_v14  ;;  %v3009_v21 = vld [vmem:[#allocation10 + $0x8] sm:$0xff]   ;;  %v541_v24 = vld [vmem:[%s3831_s22 + $0x10] sm:$0xff] }
  0xd7   : > { %2663 = vmatpush3.bf16.msra.mxu0 %v2999_v4  ;;  %v547_v18 = vadd.f32 %v543_v15, %v539_v13  ;;  %v3010_v23 = vld [vmem:[#allocation12 + $0x8] sm:$0xff]   ;;  %v542_v25 = vld [vmem:[%s3831_s22 + $0x18] sm:$0xff]  ;;  %v545_v26 = vld [vmem:[%s3838_s28 + $0x10] sm:$0xff]  ;;  %v574_v38 = vrot.slane %v3866_v0, %v573_v36  ;;  %v693_v39 = vrot.slane %v3866_v0, %v692_v37 }
  0xd8   : > { %2683 = vmatpush3.bf16.msra.mxu1 %v3000_v5  ;;  %2664 = vmatprep.subr.bf16.mxu0 %v3001_v6  ;;  %v546_v27 = vld [vmem:[%s3838_s28 + $0x18] sm:$0xff]  ;;  %v3011_v28 = vld [vmem:[#allocation10] sm:$0xff]   ;;  %v549_v30 = vadd.f32 %v545_v26, %v541_v24  ;;  %v554_v33 = vpack.c.bf16 %v542_v25, %v541_v24 }
  0xd9   : > { %2684 = vmatprep.subr.bf16.mxu1 %v3002_v7  ;;  %2696 = vmatprep.mubr.bf16.mxu1 %v553_v19  ;;  %v551_v22 = vpack.c.bf16 %v548_v20, %v547_v18  ;;  %v3012_v29 = vld [vmem:[#allocation12] sm:$0xff]   ;;  %v550_v31 = vadd.f32 %v546_v27, %v542_v25 }
  0xdb   : > { %2665 = vmatpush3.bf16.msra.mxu0 %v3001_v6  ;;  %2676 = vmatprep.mubr.bf16.mxu0 %v551_v22  ;;  %v552_v32 = vpack.c.bf16 %v550_v31, %v549_v30 }
  0xdc   : > { %2685 = vmatpush3.bf16.msra.mxu1 %v3002_v7  ;;  %2666 = vmatprep.subr.bf16.mxu0 %v3003_v8 }
  0xdd   : > { %2686 = vmatprep.subr.bf16.mxu1 %v3004_v9 }
  0xdf   : > { %2667 = vmatpush3.bf16.msra.mxu0 %v3003_v8 }
  0xe0   : > { %2687 = vmatpush3.bf16.msra.mxu1 %v3004_v9  ;;  %2668 = vmatprep.subr.bf16.mxu0 %v3005_v10 }
  0xe1   : > { %2688 = vmatprep.subr.bf16.mxu1 %v3006_v11 }
  0xe3   : > { %2669 = vmatpush3.bf16.msra.mxu0 %v3005_v10 }
  0xe4   : > { %2689 = vmatpush3.bf16.msra.mxu1 %v3006_v11  ;;  %2670 = vmatprep.subr.bf16.mxu0 %v3007_v12 }
  0xe5   : > { %2690 = vmatprep.subr.bf16.mxu1 %v3008_v16 }
  0xe7   : > { %2671 = vmatpush3.bf16.msra.mxu0 %v3007_v12 }
  0xe8   : > { %2691 = vmatpush3.bf16.msra.mxu1 %v3008_v16  ;;  %2672 = vmatprep.subr.bf16.mxu0 %v3009_v21 }
  0xe9   : > { %2692 = vmatprep.subr.bf16.mxu1 %v3010_v23 }
  0xeb   : > { %2673 = vmatpush3.bf16.msra.mxu0 %v3009_v21 }
  0xec   : > { %2693 = vmatpush3.bf16.msra.mxu1 %v3010_v23  ;;  %2674 = vmatprep.subr.bf16.mxu0 %v3011_v28 }
  0xed   : > { %2694 = vmatprep.subr.bf16.mxu1 %v3012_v29 }
  0xef   : > { %2675 = vmatpush3.bf16.msra.mxu0 %v3011_v28 }
  0xf0   : > { %2695 = vmatpush3.bf16.msra.mxu1 %v3012_v29 }
  0xf2   : > { %2677 = vmatmul.mubr.bf16.vlgmr.msra.gmra.mxu0 %v552_v32 }
  0xf3   : > { %2697 = vmatmul.mubr.bf16.vlgmr.msra.gmra.mxu1 %v554_v33 }
 0x1b2   : > { %v2678_v40 = vpop.f32.mrf.mxu0 }
 0x1b3   : > { %v666_v41 = vadd.f32 %v2678_v40, %v574_v38  ;;  %v2698_v42 = vpop.f32.mrf.mxu1 }
 0x1b4   : > { %v657_v43 = vpop.f32.mrf.mxu0  ;;  %v785_v44 = vadd.f32 %v2698_v42, %v693_v39 }
 0x1b5   : > { %v2570_v45 = vpack.c.bf16 %v666_v41, %v666_v41  ;;  %v658_v46 = vadd.f32 %v657_v43, %v574_v38  ;;  %v776_v47 = vpop.f32.mrf.mxu1 }
 0x1b6   : > { %v2574_v48 = vpack.c.bf16 %v785_v44, %v785_v44  ;;  %v2679_v49 = vpop.f32.mrf.mxu0  ;;  %v777_v50 = vadd.f32 %v776_v47, %v693_v39 }
 0x1b7   : > { %858 = vst.msk [vmem:[#allocation2 + $0x8] sm:$0xf] %vm855_vm0, %v2570_v45  ;;  %v2568_v51 = vpack.c.bf16 %v658_v46, %v658_v46  ;;  %v669_v52 = vadd.f32 %v2679_v49, %v574_v38  ;;  %v2699_v53 = vpop.f32.mrf.mxu1 }
 0x1b8   : > { %936 = vst.msk [vmem:[#allocation3 + $0x8] sm:$0xf] %vm855_vm0, %v2574_v48  ;;  %v2572_v54 = vpack.c.bf16 %v777_v50, %v777_v50  ;;  %v660_v55 = vpop.f32.mrf.mxu0  ;;  %v788_v56 = vadd.f32 %v2699_v53, %v693_v39 }
 0x1b9   : > { %856 = vst.msk [vmem:[#allocation2] sm:$0xf] %vm855_vm0, %v2568_v51  ;;  %v673_v57 = vpack.c.bf16 %v669_v52, %v666_v41  ;;  %v2571_v58 = vpack.c.bf16 %v669_v52, %v669_v52  ;;  %v661_v59 = vadd.f32 %v660_v55, %v574_v38  ;;  %v779_v60 = vpop.f32.mrf.mxu1 }
 0x1ba   : > { %934 = vst.msk [vmem:[#allocation3] sm:$0xf] %vm855_vm0, %v2572_v54  ;;  %v2575_v61 = vpack.c.bf16 %v788_v56, %v788_v56  ;;  %v780_v62 = vadd.f32 %v779_v60, %v693_v39  ;;  %v792_v4 = vpack.c.bf16 %v788_v56, %v785_v44 }
 0x1bb   : > { %859 = vst.msk [vmem:[#allocation2 + $0xc] sm:$0xf] %vm855_vm0, %v2571_v58  ;;  %v2569_v63 = vpack.c.bf16 %v661_v59, %v661_v59  ;;  %801 = vrot.lane.b32.xlu1 %v673_v57, %s3533_s24  ;;  %797 = vrot.lane.b32.xlu0 %v673_v57, %s3534_s29  ;;  %v672_v3 = vpack.c.bf16 %v661_v59, %v658_v46 }
 0x1bc   : > { %937 = vst.msk [vmem:[#allocation3 + $0xc] sm:$0xf] %vm855_vm0, %v2575_v61  ;;  %v2573_v2 = vpack.c.bf16 %v780_v62, %v780_v62  ;;  %v791_v5 = vpack.c.bf16 %v780_v62, %v777_v50 }
 0x1bd   : > { %857 = vst.msk [vmem:[#allocation2 + $0x4] sm:$0xf] %vm855_vm0, %v2569_v63 }
 0x1be   : > { %935 = vst.msk [vmem:[#allocation3 + $0x4] sm:$0xf] %vm855_vm0, %v2573_v2 }
 0x1bf   : > { %805 = vrot.lane.b32.xlu1 %v673_v57, %s3535_s7  ;;  %795 = vrot.lane.b32.xlu0 %v672_v3, %s3534_s29 }
 0x1c3   : > { %876 = vrot.lane.b32.xlu1 %v792_v4, %s3534_s29  ;;  %803 = vrot.lane.b32.xlu0 %v672_v3, %s3535_s7 }
 0x1c7   : > { %880 = vrot.lane.b32.xlu1 %v792_v4, %s3533_s24  ;;  %874 = vrot.lane.b32.xlu0 %v791_v5, %s3534_s29 }
 0x1cb   : > { %799 = vrot.lane.b32.xlu1 %v672_v3, %s3533_s24  ;;  %878 = vrot.lane.b32.xlu0 %v791_v5, %s3533_s24 }
 0x1cf   : > { %884 = vrot.lane.b32.xlu1 %v792_v4, %s3535_s7  ;;  %882 = vrot.lane.b32.xlu0 %v791_v5, %s3535_s7 }
 0x22d   : > { %v802_v6 = vpop.permute.xlu1 %801  ;;  %v798_v7 = vpop.permute.xlu0 %797 }
 0x22e   : > { %v2465_v8 = vcombine.low %v802_v6, %v802_v6  ;;  %v2466_v9 = vcombine.high %v802_v6, %v802_v6  ;;  %v2461_v10 = vcombine.low %v798_v7, %v798_v7  ;;  %v2462_v11 = vcombine.high %v798_v7, %v798_v7 }
 0x230   : > { %866 = vst.msk [vmem:[#allocation2 + $0x28] sm:$0xf] %vm855_vm0, %v2465_v8  ;;  %867 = vst.msk [vmem:[#allocation2 + $0x2c] sm:$0xf] %vm855_vm0, %v2466_v9 }
 0x231   : > { %862 = vst.msk [vmem:[#allocation2 + $0x18] sm:$0xf] %vm855_vm0, %v2461_v10  ;;  %863 = vst.msk [vmem:[#allocation2 + $0x1c] sm:$0xf] %vm855_vm0, %v2462_v11  ;;  %v806_v12 = vpop.permute.xlu1 %805  ;;  %v796_v13 = vpop.permute.xlu0 %795 }
 0x232   : > { %v2469_v14 = vcombine.low %v806_v12, %v806_v12  ;;  %v2470_v15 = vcombine.high %v806_v12, %v806_v12  ;;  %v2459_v16 = vcombine.low %v796_v13, %v796_v13  ;;  %v2460_v17 = vcombine.high %v796_v13, %v796_v13 }
 0x234   : > { %870 = vst.msk [vmem:[#allocation2 + $0x38] sm:$0xf] %vm855_vm0, %v2469_v14  ;;  %871 = vst.msk [vmem:[#allocation2 + $0x3c] sm:$0xf] %vm855_vm0, %v2470_v15 }
 0x235   : > { %860 = vst.msk [vmem:[#allocation2 + $0x10] sm:$0xf] %vm855_vm0, %v2459_v16  ;;  %861 = vst.msk [vmem:[#allocation2 + $0x14] sm:$0xf] %vm855_vm0, %v2460_v17  ;;  %v877_v18 = vpop.permute.xlu1 %876  ;;  %v804_v19 = vpop.permute.xlu0 %803 }
 0x236   : > { %v2477_v20 = vcombine.low %v877_v18, %v877_v18  ;;  %v2478_v21 = vcombine.high %v877_v18, %v877_v18  ;;  %v2467_v22 = vcombine.low %v804_v19, %v804_v19  ;;  %v2468_v23 = vcombine.high %v804_v19, %v804_v19 }
 0x238   : > { %940 = vst.msk [vmem:[#allocation3 + $0x18] sm:$0xf] %vm855_vm0, %v2477_v20  ;;  %941 = vst.msk [vmem:[#allocation3 + $0x1c] sm:$0xf] %vm855_vm0, %v2478_v21 }
 0x239   : > { %868 = vst.msk [vmem:[#allocation2 + $0x30] sm:$0xf] %vm855_vm0, %v2467_v22  ;;  %869 = vst.msk [vmem:[#allocation2 + $0x34] sm:$0xf] %vm855_vm0, %v2468_v23  ;;  %v881_v24 = vpop.permute.xlu1 %880  ;;  %v875_v25 = vpop.permute.xlu0 %874 }
 0x23a   : > { %v2481_v26 = vcombine.low %v881_v24, %v881_v24  ;;  %v2482_v27 = vcombine.high %v881_v24, %v881_v24  ;;  %v2475_v28 = vcombine.low %v875_v25, %v875_v25  ;;  %v2476_v29 = vcombine.high %v875_v25, %v875_v25 }
 0x23c   : > { %944 = vst.msk [vmem:[#allocation3 + $0x28] sm:$0xf] %vm855_vm0, %v2481_v26  ;;  %945 = vst.msk [vmem:[#allocation3 + $0x2c] sm:$0xf] %vm855_vm0, %v2482_v27 }
 0x23d   : > { %938 = vst.msk [vmem:[#allocation3 + $0x10] sm:$0xf] %vm855_vm0, %v2475_v28  ;;  %939 = vst.msk [vmem:[#allocation3 + $0x14] sm:$0xf] %vm855_vm0, %v2476_v29  ;;  %v800_v30 = vpop.permute.xlu1 %799  ;;  %v879_v31 = vpop.permute.xlu0 %878 }
 0x23e   : > { %v2463_v32 = vcombine.low %v800_v30, %v800_v30  ;;  %v2464_v33 = vcombine.high %v800_v30, %v800_v30  ;;  %v2479_v34 = vcombine.low %v879_v31, %v879_v31  ;;  %v2480_v35 = vcombine.high %v879_v31, %v879_v31 }
 0x240   : > { %864 = vst.msk [vmem:[#allocation2 + $0x20] sm:$0xf] %vm855_vm0, %v2463_v32  ;;  %865 = vst.msk [vmem:[#allocation2 + $0x24] sm:$0xf] %vm855_vm0, %v2464_v33 }
 0x241   : > { %942 = vst.msk [vmem:[#allocation3 + $0x20] sm:$0xf] %vm855_vm0, %v2479_v34  ;;  %943 = vst.msk [vmem:[#allocation3 + $0x24] sm:$0xf] %vm855_vm0, %v2480_v35  ;;  %v885_v36 = vpop.permute.xlu1 %884  ;;  %v883_v37 = vpop.permute.xlu0 %882 }
 0x242   : > { %v2485_v38 = vcombine.low %v885_v36, %v885_v36  ;;  %v2486_v39 = vcombine.high %v885_v36, %v885_v36  ;;  %v2483_v40 = vcombine.low %v883_v37, %v883_v37  ;;  %v2484_v41 = vcombine.high %v883_v37, %v883_v37 }
 0x244   : > { %948 = vst.msk [vmem:[#allocation3 + $0x38] sm:$0xf] %vm855_vm0, %v2485_v38  ;;  %949 = vst.msk [vmem:[#allocation3 + $0x3c] sm:$0xf] %vm855_vm0, %v2486_v39 }
 0x245   : > { %946 = vst.msk [vmem:[#allocation3 + $0x30] sm:$0xf] %vm855_vm0, %v2483_v40  ;;  %947 = vst.msk [vmem:[#allocation3 + $0x34] sm:$0xf] %vm855_vm0, %v2484_v41 }
 0x246 PF: > { %v3028_v42 = vld [vmem:[#allocation9 + $0x38] sm:$0xff]   ;;  %s4216_s11 = sld [smem:[#allocation27_spill]]  ;;  %v3536_v43 = vmov 0.0   ;;  %v3029_v44 = vld [vmem:[#allocation9 + $0x30] sm:$0xff]   ;;  %vm3537_vm1 = vmmov 0   ;;  %v3030_v45 = vld [vmem:[#allocation9 + $0x28] sm:$0xff]   ;;  %v976_v62 = vlaneseq }
 0x247   : > { %2700 = vmatprep.subr.bf16.mxu0 %v3536_v43  ;;  %2720 = vmatprep.subr.bf16.mxu1 %v3536_v43  ;;  %v3031_v46 = vld [vmem:[#allocation9 + $0x20] sm:$0xff]   ;;  %vm1103_vm2 = vcmask 261120   ;;  %v3036_v47 = vld [vmem:[#allocation2 + $0x8] sm:$0xff]   ;;  %v3032_v48 = vld [vmem:[#allocation9 + $0x18] sm:$0xff]   ;;  %s3538_s8 = smov 32   ;;  %s3540_s21 = smov 64  }
 0x248   : > { %2701 = vmatpush3.bf16.msra.mxu0 %v3028_v42  ;;  %2716 = vmatprep.mubr.msk.bf16.mxu0 %vm3537_vm1, %v3536_v43  ;;  %v1111_v49 = vsel %vm1103_vm2, %v3036_v47, 0  ;;  %v3033_v50 = vld [vmem:[#allocation9 + $0x10] sm:$0xff]   ;;  %v3034_v51 = vld [vmem:[#allocation9 + $0x8] sm:$0xff]   ;;  %v3035_v56 = vld [vmem:[#allocation9] sm:$0xff]   ;;  %v3947_v63 = vshrl.u32 %v976_v62, 7  ;;  %vm1692_vm3 = vcmask 523264  }
 0x249   : > { %2702 = vmatprep.subr.bf16.mxu0 %v3536_v43  ;;  %2724 = vmatprep.mubr.msk.bf16.mxu1 %vm3537_vm1, %v3536_v43  ;;  %v3037_v60 = vld [vmem:[#allocation2] sm:$0xff]   ;;  %v3038_v7 = vld [vmem:[#allocation2 + $0x18] sm:$0xff]   ;;  %v3039_v13 = vld [vmem:[#allocation2 + $0x10] sm:$0xff]   ;;  %vm1695_vm4 = vcmask 785408   ;;  %s4217_s27 = sld [smem:[#allocation28_spill]]  ;;  %s2230_s20 = sshll.u32 %s3873_s10, 4  ;;  %s4077_s20 = int_to_ptr.vmem [resolvable:$true] %s2230_s20 }
 0x24a   : > { %2721 = vmatpush3.bf16.xpose.msra.mxu1 %v1111_v49  ;;  %v1108_v61 = vsel %vm1103_vm2, %v3037_v60, 0  ;;  %v3950_v2 = vsub.s32 0, %v3947_v63  ;;  %v1171_v12 = vsel %vm1103_vm2, %v3038_v7, 0  ;;  %v1168_v14 = vsel %vm1103_vm2, %v3039_v13, 0  ;;  %v3040_v15 = vld [vmem:[#allocation2 + $0x28] sm:$0xff]   ;;  %v3041_v18 = vld [vmem:[#allocation2 + $0x20] sm:$0xff]  }
 0x24b   : > { %2722 = vmatprep.subr.bf16.mxu1 %v3536_v43  ;;  %v1231_v16 = vsel %vm1103_vm2, %v3040_v15, 0  ;;  %v1228_v19 = vsel %vm1103_vm2, %v3041_v18, 0  ;;  %v3042_v20 = vld [vmem:[#allocation2 + $0x38] sm:$0xff]   ;;  %v3043_v23 = vld [vmem:[#allocation2 + $0x30] sm:$0xff]   ;;  %s4218_s24 = sld [smem:[#allocation44_spill]]  ;;  %s4082_s7 = scalar_lea.sflag [#allocation6], %s528_s26 }
 0x24c   : > { %2703 = vmatpush3.bf16.msra.mxu0 %v3029_v44  ;;  %s2487_s0 = sshll.u32 %s4216_s11, 4  ;;  %v979_v4 = vrot.slane %v3866_v0, %v3950_v2  ;;  %v1291_v21 = vsel %vm1103_vm2, %v3042_v20, 0  ;;  %v1288_v24 = vsel %vm1103_vm2, %v3043_v23, 0 }
 0x24d   : > { %2704 = vmatprep.subr.bf16.mxu0 %v3536_v43  ;;  %s951_s3 = scalar_lea.vmem %s3831_s22, %s2487_s0 [#allocation4]  ;;  %s954_s5 = scalar_lea.vmem %s3838_s28, %s2487_s0 [#allocation7] }
 0x24e   : > { %v3934_v52 = vld [vmem:[%s951_s3] sm:$0xff]  ;;  %v3936_v53 = vld [vmem:[%s951_s3 + $0x8] sm:$0xff]  ;;  %s3539_s22 = smov 96   ;;  %s2561_s28 = sshll.u32 %s4216_s11, 1 }
 0x24f   : > { %v955_v54 = vld [vmem:[%s954_s5] sm:$0xff]  ;;  %v956_v55 = vld [vmem:[%s954_s5 + $0x8] sm:$0xff]  ;;  %s2562_s2 = sshll.u32 %s4217_s27, 2  ;;  %s3378_s11 = scalar_lea.vmem %s4077_s20, 256 }
 0x250   : > { %2705 = vmatpush3.bf16.msra.mxu0 %v3030_v45  ;;  %v957_v57 = vadd.f32 %v955_v54, %v3934_v52  ;;  %v958_v58 = vadd.f32 %v956_v55, %v3936_v53  ;;  %s2227_s25 = sadd.s32 %s2562_s2, %s2561_s28  ;;  %p3379_p3 = scmp.ne.s32.totalorder %s4077_s20, %s3378_s11 }
 0x251   : > { %2706 = vmatprep.subr.bf16.mxu0 %v3536_v43  ;;  %s2563_s16 = sshll.u32 %s2227_s25, 7  ;;  %s3542_s0 = smov [#allocation19]  }
 0x252   : > { %v959_v59 = vpack.c.bf16 %v958_v58, %v957_v57  ;;  %2723 = vmatpush3.bf16.xpose.msra.mxu1 %v1108_v61  ;;  %s4075_s29 = scalar_lea.hbm %s4218_s24, %s2563_s16  ;;  %p3380_p8 = pnand %p3379_p3, %p3780_p11 }
 0x253   : > { %2728 = vmatprep.subr.bf16.mxu1 %v3536_v43  ;;  %s3382_s3 = sshll.u32 %s3542_s0, 4  ;;  %s3383_s3 = int_to_ptr.vmem [resolvable:$false] %s3382_s3 }
 0x254   : > { %2707 = vmatpush3.bf16.msra.mxu0 %v3031_v46  ;;  %p3381_p9 = pneg %p3380_p8  ;;  %s3384_s5 = scalar_lea.vmem %s3383_s3, 512 }
 0x255   : > { %2708 = vmatprep.subr.bf16.mxu0 %v3536_v43  ;;  %p3385_p5 = scmp.lt.s32.totalorder %s4077_s20, %s3383_s3  ;;  %p3386_p13 = scmp.lt.s32.totalorder %s3384_s5, %s3378_s11 }
 0x257   : > { %p3387_p10 = por %p3386_p13, %p3385_p5 }
 0x258   : > { %2709 = vmatpush3.bf16.msra.mxu0 %v3032_v48 }
 0x259   : > { %2710 = vmatprep.subr.bf16.mxu0 %v3536_v43  ;;  %p3388_p6 = pnand %p3387_p10, %p3381_p9 }
 0x25c   : > { %2711 = vmatpush3.bf16.msra.mxu0 %v3033_v50 }
 0x25d   : > { %2712 = vmatprep.subr.bf16.mxu0 %v3536_v43 }
 0x260   : > { %2713 = vmatpush3.bf16.msra.mxu0 %v3034_v51 }
 0x261   : > { %2714 = vmatprep.subr.bf16.mxu0 %v3536_v43 }
 0x264   : > { %2715 = vmatpush3.bf16.msra.mxu0 %v3035_v56 }
 0x265   : > { %2752 = vmatprep.subr.bf16.mxu0 %v3536_v43 }
 0x267   : > { %2717 = vmatmul.mubr.bf16.vlgmr.msra.gmra.mxu0 %v959_v59 }
 0x268   : > { %2756 = vmatprep.mubr.msk.bf16.mxu0 %vm3537_vm1, %v3536_v43 }
 0x327   : > { %v1062_v3 = vpop.f32.mrf.mxu0 }
 0x328   : > { %v1063_v8 = vadd.f32 %v1062_v3, %v979_v4  ;;  %v3044_v3 = vld [vmem:[#allocation3 + $0x8] sm:$0xff]  }
 0x329   : > { %v2718_v5 = vpop.f32.mrf.mxu0  ;;  %2753 = vmatpush3.bf16.msra.mxu0 %v3044_v3 }
 0x32a   : > { %2754 = vmatprep.subr.bf16.mxu0 %v3536_v43 }
 0x32b   : > { %v1065_v6 = vpop.f32.mrf.mxu0 }
 0x32c   : > { %v1066_v9 = vadd.f32 %v1065_v6, %v979_v4  ;;  %v3045_v4 = vld [vmem:[#allocation3] sm:$0xff]  }
 0x32d   : > { %v2719_v10 = vpop.f32.mrf.mxu0  ;;  %2755 = vmatpush3.bf16.msra.mxu0 %v3045_v4 }
 0x32e   : > { %v1069_v11 = vpack.c.bf16 %v1066_v9, %v1063_v8  ;;  %2768 = vmatprep.subr.bf16.mxu0 %v3536_v43 }
 0x330   : > { %1075 = vrot.lane.b32.xlu1 %v1069_v11, %s3538_s8  ;;  %1071 = vrot.lane.b32.xlu0 %v1069_v11, %s3539_s22 }
 0x331   : > { %2725 = vmatmul.mubr.msk.bf16.vlgmr.msra.gmra.mxu1 %vm1103_vm2, %v1069_v11 }
 0x332   : > { %2729 = vmatpush3.bf16.xpose.msra.mxu1 %v1171_v12  ;;  %2732 = vmatprep.mubr.msk.bf16.mxu1 %vm3537_vm1, %v3536_v43 }
 0x333   : > { %2730 = vmatprep.subr.bf16.mxu1 %v3536_v43 }
 0x334   : > { %1073 = vrot.lane.b32.xlu0 %v1069_v11, %s3540_s21 }
 0x33a   : > { %2731 = vmatpush3.bf16.xpose.msra.mxu1 %v1168_v14 }
 0x33b   : > { %2736 = vmatprep.subr.bf16.mxu1 %v3536_v43 }
 0x3a2   : > { %v1072_v17 = vpop.permute.xlu0 %1071  ;;  %v1076_v25 = vpop.permute.xlu1 %1075 }
 0x3a3   : > { %2733 = vmatmul.mubr.msk.bf16.vlgmr.msra.gmra.mxu1 %vm1103_vm2, %v1072_v17 }
 0x3a4   : > { %2737 = vmatpush3.bf16.xpose.msra.mxu1 %v1231_v16  ;;  %2740 = vmatprep.mubr.msk.bf16.mxu1 %vm3537_vm1, %v3536_v43 }
 0x3a5   : > { %2738 = vmatprep.subr.bf16.mxu1 %v3536_v43 }
 0x3a6   : > { %v1074_v22 = vpop.permute.xlu0 %1073 }
 0x3ac   : > { %2739 = vmatpush3.bf16.xpose.msra.mxu1 %v1228_v19 }
 0x3ad   : > { %2744 = vmatprep.subr.bf16.mxu1 %v3536_v43 }
 0x3b3   : > { %2741 = vmatmul.mubr.msk.bf16.vlgmr.msra.gmra.mxu1 %vm1103_vm2, %v1074_v22 }
 0x3b4   : > { %2745 = vmatpush3.bf16.xpose.msra.mxu1 %v1291_v21  ;;  %2748 = vmatprep.mubr.msk.bf16.mxu1 %vm3537_vm1, %v3536_v43 }
 0x3b5   : > { %2746 = vmatprep.subr.bf16.mxu1 %v3536_v43 }
 0x3bc   : > { %2747 = vmatpush3.bf16.xpose.msra.mxu1 %v1288_v24 }
 0x3bd   : > { %2760 = vmatprep.subr.bf16.mxu1 %v3536_v43 }
 0x3c3   : > { %2749 = vmatmul.mubr.msk.bf16.vlgmr.msra.gmra.mxu1 %vm1103_vm2, %v1076_v25 }
 0x3c4   : > { %2764 = vmatprep.mubr.msk.bf16.mxu1 %vm3537_vm1, %v3536_v43 }
 0x3f1   : > { %v1147_v26 = vpop.f32.mrf.mxu1 }
 0x3f2   : > { %v1334_v27 = vsel %vm1103_vm2, %v1147_v26, -inf }
 0x3f3   : > { %1335 = vmax.xlane.f32.xlu1 %v1334_v27  ;;  %v2726_v28 = vpop.f32.mrf.mxu1 }
 0x3f5   : > { %v1150_v29 = vpop.f32.mrf.mxu1 }
 0x3f6   : > { %v1337_v30 = vsel %vm1103_vm2, %v1150_v29, -inf }
 0x3f7   : > { %1338 = vmax.xlane.f32.xlu0 %v1337_v30  ;;  %v2727_v31 = vpop.f32.mrf.mxu1 }
 0x463   : > { %v1207_v32 = vpop.f32.mrf.mxu1 }
 0x464   : > { %v1340_v33 = vsel %vm1103_vm2, %v1207_v32, -inf }
 0x465   : > { %1341 = vmax.xlane.f32.xlu0 %v1340_v33  ;;  %v2734_v34 = vpop.f32.mrf.mxu1 }
 0x466   : > { %v3047_v34 = vld [vmem:[#allocation3 + $0x10] sm:$0xff]  }
 0x467   : > { %v1210_v35 = vpop.f32.mrf.mxu1 }
 0x468   : > { %v1343_v36 = vsel %vm1103_vm2, %v1210_v35, -inf }
 0x469   : > { %1344 = vmax.xlane.f32.xlu1 %v1343_v36  ;;  %v2735_v37 = vpop.f32.mrf.mxu1 }
 0x473   : > { %v1267_v38 = vpop.f32.mrf.mxu1 }
 0x474   : > { %v1346_v39 = vsel %vm1103_vm2, %v1267_v38, -inf }
 0x475   : > { %1347 = vmax.xlane.f32.xlu0 %v1346_v39  ;;  %v2742_v40 = vpop.f32.mrf.mxu1 }
 0x477   : > { %v1270_v41 = vpop.f32.mrf.mxu1 }
 0x478   : > { %v1349_v42 = vsel %vm1103_vm2, %v1270_v41, -inf }
 0x479   : > { %1350 = vmax.xlane.f32.xlu1 %v1349_v42  ;;  %v2743_v44 = vpop.f32.mrf.mxu1 }
 0x47a   : > { %v3048_v44 = vld [vmem:[#allocation3 + $0x28] sm:$0xff]  }
 0x47c   : > { %v1336_v45 = vpop.xlane.xlu1 %1335 }
 0x47d   : > { %v1358_v46 = vsub.f32 %v1147_v26, %v1336_v45 }
 0x47f   : > { %v1366_v47 = vmul.f32 1.442695, %v1358_v46  ;;  %v3049_v46 = vld [vmem:[#allocation3 + $0x20] sm:$0xff]  }
 0x480   : > { %v1339_v48 = vpop.xlane.xlu0 %1338 }
 0x481   : > { %3100 = vpow2.f32 %v1366_v47  ;;  %v1359_v49 = vsub.f32 %v1150_v29, %v1339_v48 }
 0x483   : > { %v1368_v50 = vmul.f32 1.442695, %v1359_v49  ;;  %v1327_v51 = vpop.f32.mrf.mxu1 }
 0x484   : > { %v1352_v54 = vsel %vm1103_vm2, %v1327_v51, -inf }
 0x485   : > { %3102 = vpow2.f32 %v1368_v50  ;;  %1353 = vmax.xlane.f32.xlu0 %v1352_v54  ;;  %v2750_v55 = vpop.f32.mrf.mxu1 }
 0x487   : > { %v1330_v56 = vpop.f32.mrf.mxu1 }
 0x488   : > { %v1355_v57 = vsel %vm1103_vm2, %v1330_v56, -inf }
 0x489   : > { %1356 = vmax.xlane.f32.xlu1 %v1355_v57  ;;  %v2751_v58 = vpop.f32.mrf.mxu1  ;;  %v3050_v57 = vld [vmem:[#allocation3 + $0x38] sm:$0xff]  }
 0x48e   : > { %v3989_v59 = vpop.eup %3100 }
 0x48f   : > { %v1382_v60 = vsel %vm1103_vm2, %v3989_v59, 0.0 }
 0x490   : > { %1383 = vadd.xlane.f32.xlu0 %v1382_v60 }
 0x492   : > { %v3993_v61 = vpop.eup %3102 }
 0x493   : > { %v1385_v62 = vsel %vm1103_vm2, %v3993_v61, 0.0 }
 0x494   : > { %1386 = vadd.xlane.f32.xlu1 %v1385_v62 }
 0x4ee   : > { %v1342_v5 = vpop.xlane.xlu0 %1341 }
 0x4ef   : > { %v1360_v6 = vsub.f32 %v1207_v32, %v1342_v5  ;;  %v3046_v32 = vld [vmem:[#allocation3 + $0x18] sm:$0xff]  }
 0x4f0   : > { %2761 = vmatpush3.bf16.msra.mxu1 %v3046_v32 }
 0x4f1   : > { %v1370_v7 = vmul.f32 1.442695, %v1360_v6  ;;  %2762 = vmatprep.subr.bf16.mxu1 %v3536_v43 }
 0x4f2   : > { %v1345_v8 = vpop.xlane.xlu1 %1344 }
 0x4f3   : > { %3104 = vpow2.f32 %v1370_v7  ;;  %v1361_v9 = vsub.f32 %v1210_v35, %v1345_v8 }
 0x4f4   : > { %2763 = vmatpush3.bf16.msra.mxu1 %v3047_v34 }
 0x4f5   : > { %v1372_v10 = vmul.f32 1.442695, %v1361_v9  ;;  %2776 = vmatprep.subr.bf16.mxu1 %v3536_v43 }
 0x4f7   : > { %3106 = vpow2.f32 %v1372_v10 }
 0x4fe   : > { %v1348_v11 = vpop.xlane.xlu0 %1347 }
 0x4ff   : > { %v1362_v12 = vsub.f32 %v1267_v38, %v1348_v11 }
 0x500   : > { %v3999_v13 = vpop.eup %3104 }
 0x501   : > { %v1374_v14 = vmul.f32 1.442695, %v1362_v12  ;;  %v1388_v15 = vsel %vm1103_vm2, %v3999_v13, 0.0 }
 0x502   : > { %v1351_v16 = vpop.xlane.xlu1 %1350  ;;  %1389 = vadd.xlane.f32.xlu0 %v1388_v15 }
 0x503   : > { %3108 = vpow2.f32 %v1374_v14  ;;  %v1363_v17 = vsub.f32 %v1270_v41, %v1351_v16  ;;  %v3052_v16 = vld [vmem:[#allocation13 + $0x38] sm:$0xff]  }
 0x504   : > { %v3107_v18 = vpop.eup %3106 }
 0x505   : > { %v1376_v19 = vmul.f32 1.442695, %v1363_v17  ;;  %v1391_v20 = vsel %vm1103_vm2, %v3107_v18, 0.0  ;;  %v3053_v17 = vld [vmem:[#allocation13 + $0x30] sm:$0xff]  }
 0x506   : > { %1392 = vadd.xlane.f32.xlu1 %v1391_v20  ;;  %v3054_v20 = vld [vmem:[#allocation13 + $0x28] sm:$0xff]  }
 0x507   : > { %3110 = vpow2.f32 %v1376_v19 }
 0x50e   : > { %v1354_v21 = vpop.xlane.xlu0 %1353 }
 0x50f   : > { %v1364_v22 = vsub.f32 %v1327_v51, %v1354_v21 }
 0x510   : > { %v4004_v23 = vpop.eup %3108 }
 0x511   : > { %v1378_v24 = vmul.f32 1.442695, %v1364_v22  ;;  %v1394_v25 = vsel %vm1103_vm2, %v4004_v23, 0.0 }
 0x512   : > { %1395 = vadd.xlane.f32.xlu0 %v1394_v25  ;;  %v1357_v26 = vpop.xlane.xlu1 %1356  ;;  %v3056_v25 = vld [vmem:[#allocation13 + $0x18] sm:$0xff]  }
 0x513   : > { %3112 = vpow2.f32 %v1378_v24  ;;  %v1365_v27 = vsub.f32 %v1330_v56, %v1357_v26  ;;  %v3055_v24 = vld [vmem:[#allocation13 + $0x20] sm:$0xff]  }
 0x514   : > { %v3111_v28 = vpop.eup %3110 }
 0x515   : > { %v1380_v29 = vmul.f32 1.442695, %v1365_v27  ;;  %v1397_v30 = vsel %vm1103_vm2, %v3111_v28, 0.0  ;;  %v3057_v27 = vld [vmem:[#allocation13 + $0x10] sm:$0xff]  }
 0x516   : > { %1398 = vadd.xlane.f32.xlu1 %v1397_v30  ;;  %v3058_v30 = vld [vmem:[#allocation13 + $0x8] sm:$0xff]  }
 0x517   : > { %3114 = vpow2.f32 %v1380_v29 }
 0x519   : > { %v1384_v31 = vpop.xlane.xlu0 %1383 }
 0x51a   : > { %3116 = vrcp.f32 %v1384_v31 }
 0x51d   : > { %v1387_v33 = vpop.xlane.xlu1 %1386 }
 0x51e   : > { %3118 = vrcp.f32 %v1387_v33  ;;  %v3059_v33 = vld [vmem:[#allocation13] sm:$0xff]  }
 0x520   : > { %v3113_v35 = vpop.eup %3112 }
 0x521   : > { %v1400_v36 = vsel %vm1103_vm2, %v3113_v35, 0.0 }
 0x522   : > { %1401 = vadd.xlane.f32.xlu0 %v1400_v36 }
 0x524   : > { %v3115_v37 = vpop.eup %3114 }
 0x525   : > { %v1403_v38 = vsel %vm1103_vm2, %v3115_v37, 0.0 }
 0x526   : > { %1404 = vadd.xlane.f32.xlu1 %v1403_v38 }
 0x527   : > { %v3117_v39 = vpop.eup %3116 }
 0x528   : > { %v1414_v41 = vmul.f32 %v3117_v39, %v3989_v59  ;;  %v3051_v59 = vld [vmem:[#allocation3 + $0x30] sm:$0xff]  }
 0x52b   : > { %v3119_v40 = vpop.eup %3118 }
 0x52c   : > { %v1415_v42 = vmul.f32 %v3119_v40, %v3993_v61 }
 0x52e   : > { %v1422_v45 = vpack.c.bf16 %v1415_v42, %v1414_v41 }
 0x530   : > { %2757 = vmatmul.mubr.msk.bf16.vlgmr.msra.gmra.mxu0 %vm1103_vm2, %v1422_v45 }
 0x531   : > { %2769 = vmatpush3.bf16.msra.mxu0 %v3048_v44  ;;  %2772 = vmatprep.mubr.msk.bf16.mxu0 %vm3537_vm1, %v3536_v43 }
 0x532   : > { %2770 = vmatprep.subr.bf16.mxu0 %v3536_v43 }
 0x535   : > { %2771 = vmatpush3.bf16.msra.mxu0 %v3049_v46 }
 0x536   : > { %2784 = vmatprep.subr.bf16.mxu0 %v3536_v43 }
 0x58b   : > { %v1390_v47 = vpop.xlane.xlu0 %1389 }
 0x58c   : > { %3120 = vrcp.f32 %v1390_v47 }
 0x58f   : > { %v1393_v48 = vpop.xlane.xlu1 %1392 }
 0x590   : > { %3122 = vrcp.f32 %v1393_v48 }
 0x599   : > { %v3121_v49 = vpop.eup %3120 }
 0x59a   : > { %v1416_v54 = vmul.f32 %v3121_v49, %v3999_v13 }
 0x59b   : > { %v1396_v50 = vpop.xlane.xlu0 %1395 }
 0x59c   : > { %3124 = vrcp.f32 %v1396_v50 }
 0x59d   : > { %v3123_v51 = vpop.eup %3122 }
 0x59e   : > { %v1417_v55 = vmul.f32 %v3123_v51, %v3107_v18 }
 0x59f   : > { %v1399_v56 = vpop.xlane.xlu1 %1398 }
 0x5a0   : > { %3126 = vrcp.f32 %v1399_v56  ;;  %v1423_v58 = vpack.c.bf16 %v1417_v55, %v1416_v54 }
 0x5a2   : > { %2765 = vmatmul.mubr.msk.bf16.vlgmr.msra.gmra.mxu1 %vm1103_vm2, %v1423_v58 }
 0x5a3   : > { %2777 = vmatpush3.bf16.msra.mxu1 %v3050_v57  ;;  %2780 = vmatprep.mubr.msk.bf16.mxu1 %vm3537_vm1, %v3536_v43  ;;  %v1717_v57 = vsub.s32 3, %v3947_v63 }
 0x5a4   : > { %2778 = vmatprep.subr.bf16.mxu1 %v3536_v43 }
 0x5a5   : > { %v1718_v58 = vrot.slane %v3866_v0, %v1717_v57 }
 0x5a7   : > { %2779 = vmatpush3.bf16.msra.mxu1 %v3051_v59 }
 0x5a9   : > { %v3125_v60 = vpop.eup %3124 }
 0x5aa   : > { %v1418_v3 = vmul.f32 %v3125_v60, %v4004_v23 }
 0x5ab   : > { %v1402_v61 = vpop.xlane.xlu0 %1401 }
 0x5ac   : > { %3128 = vrcp.f32 %v1402_v61 }
 0x5ad   : > { %v3127_v62 = vpop.eup %3126 }
 0x5ae   : > { %v1419_v4 = vmul.f32 %v3127_v62, %v3111_v28 }
 0x5af   : > { %v1405_v5 = vpop.xlane.xlu1 %1404 }
 0x5b0   : > { %3130 = vrcp.f32 %v1405_v5  ;;  %v1424_v6 = vpack.c.bf16 %v1419_v4, %v1418_v3 }
 0x5b2   : > { %2773 = vmatmul.mubr.msk.bf16.vlgmr.msra.gmra.mxu0 %vm1103_vm2, %v1424_v6 }
 0x5b3   : > { %2800 = vmatprep.mubr.msk.bf16.mxu0 %vm3537_vm1, %v3536_v43  ;;  %2785 = vmatpush3.bf16.msra.mxu0 %v3052_v16  ;;  %v3063_v16 = vld [vmem:[#allocation15 + $0x60] ss:$8 sps:$4 sm:$0xff]  }
 0x5b4   : > { %2786 = vmatprep.subr.bf16.mxu0 %v3536_v43 }
 0x5b7   : > { %2787 = vmatpush3.bf16.msra.mxu0 %v3053_v17  ;;  %v3068_v17 = vld [vmem:[#allocation15 + $0x54] ss:$8 sps:$4 sm:$0xff]  }
 0x5b8   : > { %2788 = vmatprep.subr.bf16.mxu0 %v3536_v43 }
 0x5b9   : > { %v3129_v7 = vpop.eup %3128 }
 0x5ba   : > { %v1420_v9 = vmul.f32 %v3129_v7, %v3113_v35  ;;  %v3060_v7 = vld [vmem:[#allocation15 + $0x70] ss:$8 sps:$4 sm:$0xff]  }
 0x5bb   : > { %2789 = vmatpush3.bf16.msra.mxu0 %v3054_v20  ;;  %v3071_v20 = vld [vmem:[#allocation15 + $0x44] ss:$8 sps:$4 sm:$0xff]  }
 0x5bc   : > { %2790 = vmatprep.subr.bf16.mxu0 %v3536_v43 }
 0x5bd   : > { %v3131_v8 = vpop.eup %3130 }
 0x5be   : > { %v1421_v10 = vmul.f32 %v3131_v8, %v3115_v37  ;;  %v3062_v8 = vld [vmem:[#allocation15 + $0x74] ss:$8 sps:$4 sm:$0xff]  }
 0x5bf   : > { %2791 = vmatpush3.bf16.msra.mxu0 %v3055_v24  ;;  %1954 = vmatprep.subr.bf16.mxu1 %v3062_v8  ;;  %v3541_v24 = vmov 0   ;;  %v1862_v8 = vld [vmem:[#allocation16] sm:$0x3] }
 0x5c0   : > { %v1425_v11 = vpack.c.bf16 %v1421_v10, %v1420_v9  ;;  %2792 = vmatprep.subr.bf16.mxu0 %v3536_v43 }
 0x5c2   : > { %2781 = vmatmul.mubr.msk.bf16.vlgmr.msra.gmra.mxu1 %vm1103_vm2, %v1425_v11 }
 0x5c3   : > { %2793 = vmatpush3.bf16.msra.mxu0 %v3056_v25  ;;  %1955 = vmatpush1.bf16.msra.mxu1 %v3060_v7  ;;  %v3075_v25 = vld [vmem:[#allocation15 + $0x20] ss:$8 sps:$4 sm:$0xff]   ;;  %v1870_v7 = vsub.s32 1, %v3947_v63 }
 0x5c4   : > { %2794 = vmatprep.subr.bf16.mxu0 %v3536_v43  ;;  %1986 = vmatprep.mubr.bf16.mxu1 %v3541_v24 }
 0x5c7   : > { %2795 = vmatpush3.bf16.msra.mxu0 %v3057_v27  ;;  %v3078_v27 = vld [vmem:[#allocation15 + $0x10] ss:$8 sps:$4 sm:$0xff]  }
 0x5c8   : > { %2796 = vmatprep.subr.bf16.mxu0 %v3536_v43 }
 0x5cb   : > { %2797 = vmatpush3.bf16.msra.mxu0 %v3058_v30  ;;  %v3084_v30 = vld [vmem:[#allocation18 + $0x78] sm:$0xff]  }
 0x5cc   : > { %2798 = vmatprep.subr.bf16.mxu0 %v3536_v43 }
 0x5cf   : > { %2799 = vmatpush3.bf16.msra.mxu0 %v3059_v33  ;;  %v3087_v33 = vld [vmem:[#allocation18 + $0x30] sm:$0xff]  }
 0x5d0   : > { %2638 = vmatprep.subr.bf16.mxu0 %v3084_v30 }
 0x5f0   : > { %v1491_v12 = vpop.f32.mrf.mxu0 }
 0x5f2   : > { %v2758_v13 = vpop.f32.mrf.mxu0 }
 0x5f4   : > { %v1494_v14 = vpop.f32.mrf.mxu0 }
 0x5f6   : > { %v2759_v15 = vpop.f32.mrf.mxu0 }
 0x5f7   : > { %v3065_v15 = vld [vmem:[#allocation15 + $0x64] ss:$8 sps:$4 sm:$0xff]  }
 0x5f8   : > { %1956 = vmatprep.subr.bf16.mxu1 %v3065_v15 }
 0x5f9   : > { %1957 = vmatpush1.bf16.msra.mxu1 %v3063_v16 }
 0x5fa   : > { %1958 = vmatprep.subr.bf16.mxu1 %v3068_v17 }
 0x662   : > { %v1547_v18 = vpop.f32.mrf.mxu1 }
 0x664   : > { %v2766_v19 = vpop.f32.mrf.mxu1 }
 0x665   : > { %v3069_v19 = vld [vmem:[#allocation15 + $0x40] ss:$8 sps:$4 sm:$0xff]  }
 0x666   : > { %v1550_v21 = vpop.f32.mrf.mxu1 }
 0x667   : > { %v3013_v22 = vpack.i.bf16 %v1550_v21, %v1547_v18  ;;  %v3066_v18 = vld [vmem:[#allocation15 + $0x50] ss:$8 sps:$4 sm:$0xff]   ;;  %v3074_v21 = vld [vmem:[#allocation15 + $0x34] ss:$8 sps:$4 sm:$0xff]  }
 0x668   : > { %v2767_v23 = vpop.f32.mrf.mxu1  ;;  %1959 = vmatpush1.bf16.msra.mxu1 %v3066_v18 }
 0x669   : > { %3014 = vrot.lane.b32.xlu0 %v3013_v22, %s3538_s8  ;;  %1960 = vmatprep.subr.bf16.mxu1 %v3071_v20  ;;  %v3072_v22 = vld [vmem:[#allocation15 + $0x30] ss:$8 sps:$4 sm:$0xff]   ;;  %v3077_v23 = vld [vmem:[#allocation15 + $0x24] ss:$8 sps:$4 sm:$0xff]  }
 0x66c   : > { %1961 = vmatpush1.bf16.msra.mxu1 %v3069_v19 }
 0x66d   : > { %1962 = vmatprep.subr.bf16.mxu1 %v3074_v21 }
 0x670   : > { %1963 = vmatpush1.bf16.msra.mxu1 %v3072_v22 }
 0x671   : > { %1964 = vmatprep.subr.bf16.mxu1 %v3077_v23  ;;  %v2037_v23 = vsub.s32 4, %v3947_v63 }
 0x672   : > { %v1603_v26 = vpop.f32.mrf.mxu0 }
 0x674   : > { %v2774_v28 = vpop.f32.mrf.mxu0  ;;  %1965 = vmatpush1.bf16.msra.mxu1 %v3075_v25  ;;  %v2038_v25 = vrot.slane %v3866_v0, %v2037_v23 }
 0x675   : > { %v3083_v28 = vld [vmem:[#allocation15 + $0x4] ss:$8 sps:$4 sm:$0xff]  }
 0x676   : > { %v1606_v29 = vpop.f32.mrf.mxu0 }
 0x677   : > { %v3018_v31 = vpack.i.bf16 %v1606_v29, %v1603_v26  ;;  %v3080_v26 = vld [vmem:[#allocation15 + $0x14] ss:$8 sps:$4 sm:$0xff]   ;;  %v3081_v29 = vld [vmem:[#allocation15] ss:$8 sps:$4 sm:$0xff]  }
 0x678   : > { %v2775_v32 = vpop.f32.mrf.mxu0  ;;  %1966 = vmatprep.subr.bf16.mxu1 %v3080_v26 }
 0x679   : > { %3019 = vrot.lane.b32.xlu1 %v3018_v31, %s3540_s21  ;;  %1967 = vmatpush1.bf16.msra.mxu1 %v3078_v27  ;;  %v3085_v31 = vld [vmem:[#allocation18 + $0x38] sm:$0xff]   ;;  %v3086_v32 = vld [vmem:[#allocation18 + $0x70] sm:$0xff]  }
 0x67a   : > { %1968 = vmatprep.subr.bf16.mxu1 %v3083_v28 }
 0x67d   : > { %1969 = vmatpush1.bf16.msra.mxu1 %v3081_v29 }
 0x682   : > { %v1659_v34 = vpop.f32.mrf.mxu1 }
 0x684   : > { %v2782_v35 = vpop.f32.mrf.mxu1 }
 0x685   : > { %v3089_v35 = vld [vmem:[#allocation18 + $0x28] sm:$0xff]  }
 0x686   : > { %v1662_v36 = vpop.f32.mrf.mxu1 }
 0x687   : > { %v3023_v37 = vpack.i.bf16 %v1662_v36, %v1659_v34  ;;  %v3088_v34 = vld [vmem:[#allocation18 + $0x68] sm:$0xff]   ;;  %v3090_v36 = vld [vmem:[#allocation18 + $0x60] sm:$0xff]  }
 0x688   : > { %v2783_v38 = vpop.f32.mrf.mxu1 }
 0x689   : > { %3024 = vrot.lane.b32.xlu1 %v3023_v37, %s3539_s22  ;;  %v3091_v37 = vld [vmem:[#allocation18 + $0x20] sm:$0xff]   ;;  %v3092_v38 = vld [vmem:[#allocation18 + $0x58] sm:$0xff]  }
 0x6db   : > { %v3015_v39 = vpop.permute.xlu0 %3014 }
 0x6dc   : > { %v3017_v41 = vunpack.i.h.bf16 %v3015_v39  ;;  %v3016_v42 = vunpack.i.l.bf16 %v3015_v39  ;;  %v3093_v39 = vld [vmem:[#allocation18 + $0x18] sm:$0xff]  }
 0x6de   : > { %v1690_v43 = vsel %vm1103_vm2, %v1491_v12, %v3016_v42  ;;  %v1691_v47 = vsel %vm1103_vm2, %v1494_v14, %v3017_v41 }
 0x6eb   : > { %v3020_v40 = vpop.permute.xlu1 %3019 }
 0x6ec   : > { %v3022_v44 = vunpack.i.h.bf16 %v3020_v40  ;;  %v3021_v45 = vunpack.i.l.bf16 %v3020_v40 }
 0x6ee   : > { %v1694_v50 = vsel %vm1692_vm3, %v1691_v47, %v3022_v44  ;;  %v1693_v51 = vsel %vm1692_vm3, %v1690_v43, %v3021_v45  ;;  %v1835_v43 = vsub.s32 5, %v3947_v63 }
 0x6fb   : > { %v3025_v46 = vpop.permute.xlu1 %3024 }
 0x6fc   : > { %v3027_v48 = vunpack.i.h.bf16 %v3025_v46  ;;  %v3026_v49 = vunpack.i.l.bf16 %v3025_v46 }
 0x6fe   : > { %v1696_v54 = vsel %vm1695_vm4, %v1693_v51, %v3026_v49  ;;  %v1697_v55 = vsel %vm1695_vm4, %v1694_v50, %v3027_v48  ;;  %v1836_v49 = vrot.slane %v3866_v0, %v1835_v43  ;;  %v1841_v50 = vsub.s32 6, %v3947_v63 }
 0x6ff   : > { %v1698_v56 = vpack.c.bf16 %v1697_v55, %v1696_v54 }
 0x701   : > { %2801 = vmatmul.mubr.bf16.vlgmr.msra.gmra.mxu0 %v1698_v56  ;;  %v1842_v56 = vrot.slane %v3866_v0, %v1841_v50 }
 0x702   : > { %2639 = vmatpush3.bf16.msra.mxu0 %v3085_v31 }
 0x703   : > { %2640 = vmatprep.subr.bf16.mxu0 %v3086_v32 }
 0x706   : > { %2641 = vmatpush3.bf16.msra.mxu0 %v3087_v33 }
 0x707   : > { %2642 = vmatprep.subr.bf16.mxu0 %v3088_v34 }
 0x70a   : > { %2643 = vmatpush3.bf16.msra.mxu0 %v3089_v35 }
 0x70b   : > { %2644 = vmatprep.subr.bf16.mxu0 %v3090_v36 }
 0x70e   : > { %2645 = vmatpush3.bf16.msra.mxu0 %v3091_v37 }
 0x70f   : > { %2646 = vmatprep.subr.bf16.mxu0 %v3092_v38 }
 0x712   : > { %2647 = vmatpush3.bf16.msra.mxu0 %v3093_v39 }
 0x7c1   : > { %v1801_v59 = vpop.f32.mrf.mxu0 }
 0x7c2   : > { %v1802_v60 = vadd.f32 %v1801_v59, %v1718_v58 }
 0x7c3   : > { %v2802_v61 = vpop.f32.mrf.mxu0 }
 0x7c4   : > { %v1808_v62 = vadd.f32 %v1802_v60, %v3934_v52  ;;  %v3094_v61 = vld [vmem:[#allocation18 + $0x50] sm:$0xff]  }
 0x7c5   : > { %v1804_v3 = vpop.f32.mrf.mxu0  ;;  %2648 = vmatprep.subr.bf16.mxu0 %v3094_v61 }
 0x7c6   : > { %v1805_v4 = vadd.f32 %v1804_v3, %v1718_v58  ;;  %1810 = vadd.xlane.f32.xlu0 %v1808_v62  ;;  %v3096_v3 = vld [vmem:[#allocation18 + $0x48] sm:$0xff]  }
 0x7c7   : > { %v2803_v5 = vpop.f32.mrf.mxu0 }
 0x7c8   : > { %v1809_v6 = vadd.f32 %v1805_v4, %v3936_v53  ;;  %v3097_v4 = vld [vmem:[#allocation18 + $0x8] sm:$0xff]   ;;  %v3098_v5 = vld [vmem:[#allocation18 + $0x40] sm:$0xff]  }
 0x7ca   : > { %1812 = vadd.xlane.f32.xlu1 %v1809_v6 }
 0x84f   : > { %v1811_v9 = vpop.xlane.xlu0 %1810 }
 0x850   : > { %v1815_v10 = vmul.f32 0.0078125, %v1811_v9 }
 0x852   : > { %v4046_v11 = vsub.f32 %v1808_v62, %v1815_v10  ;;  %v3095_v62 = vld [vmem:[#allocation18 + $0x10] sm:$0xff]   ;;  %v1871_v10 = vrot.slane %v1862_v8, %v1870_v7 }
 0x853   : > { %v1813_v12 = vpop.xlane.xlu1 %1812  ;;  %2649 = vmatpush3.bf16.msra.mxu0 %v3095_v62 }
 0x854   : > { %v1816_v13 = vmul.f32 0.0078125, %v1813_v12  ;;  %v1819_v52 = vmul.f32 %v4046_v11, %v4046_v11  ;;  %2650 = vmatprep.subr.bf16.mxu0 %v3096_v3 }
 0x856   : > { %v4050_v14 = vsub.f32 %v1809_v6, %v1816_v13  ;;  %1821 = vadd.xlane.f32.xlu0 %v1819_v52  ;;  %v3099_v6 = vld [vmem:[#allocation18] sm:$0xff]  }
 0x857   : > { %2651 = vmatpush3.bf16.msra.mxu0 %v3097_v4 }
 0x858   : > { %v1820_v53 = vmul.f32 %v4050_v14, %v4050_v14  ;;  %2652 = vmatprep.subr.bf16.mxu0 %v3098_v5 }
 0x85a   : > { %1823 = vadd.xlane.f32.xlu0 %v1820_v53 }
 0x85b   : > { %2653 = vmatpush3.bf16.msra.mxu0 %v3099_v6 }
 0x8df   : > { %v1822_v40 = vpop.xlane.xlu0 %1821 }
 0x8e0   : > { %v1825_v41 = vmul.f32 0.0078125, %v1822_v40 }
 0x8e2   : > { %v1827_v42 = vadd.f32 1e-05, %v1825_v41 }
 0x8e3   : > { %v1824_v44 = vpop.xlane.xlu0 %1823 }
 0x8e4   : > { %3132 = vrsqrt.f32 %v1827_v42  ;;  %v1826_v45 = vmul.f32 0.0078125, %v1824_v44 }
 0x8e6   : > { %v1828_v46 = vadd.f32 1e-05, %v1826_v45 }
 0x8e8   : > { %3134 = vrsqrt.f32 %v1828_v46 }
 0x8f1   : > { %v3133_v47 = vpop.eup %3132 }
 0x8f2   : > { %v1831_v48 = vmul.f32 %v3133_v47, %v4046_v11  ;;  %v1867_v11 = vrot.slane %v1862_v8, %v3950_v2 }
 0x8f4   : > { %v1837_v55 = vmul.f32 %v1836_v49, %v1831_v48 }
 0x8f5   : > { %v3135_v51 = vpop.eup %3134 }
 0x8f6   : > { %v1832_v54 = vmul.f32 %v3135_v51, %v4050_v14  ;;  %v1843_v58 = vadd.f32 %v1842_v56, %v1837_v55 }
 0x8f8   : > { %v1838_v57 = vmul.f32 %v1836_v49, %v1832_v54  ;;  %v2202_v49 = vsub.s32 7, %v3947_v63  ;;  %v2209_v54 = vrot.slane %v3871_v1, %v3950_v2 }
 0x8fa   : > { %v1844_v59 = vadd.f32 %v1842_v56, %v1838_v57  ;;  %v2203_v50 = vrot.slane %v3866_v0, %v2202_v49 }
 0x8fc   : > { %v1845_v60 = vpack.c.bf16 %v1844_v59, %v1843_v58 }
 0x8fe   : > { %1987 = vmatmul.mubr.bf16.vlgmr.msra.gmra.mxu1 %v1845_v60 }
 0x9be   : > { %v1988_v9 = vpop.f32.mrf.mxu1 }
 0x9bf   : > { %v1989_v53 = vadd.f32 %v1988_v9, %v1867_v11 }
 0x9c0   : > { %v1990_v12 = vpop.f32.mrf.mxu1 }
 0x9c1   : > { %v1991_v52 = vadd.f32 %v1990_v12, %v1871_v10  ;;  %v1997_v20 = vmax.f32 %v1989_v53, 0.0 }
 0x9c2   : > { %v1992_v13 = vpop.f32.mrf.mxu1 }
 0x9c3   : > { %v1993_v14 = vadd.f32 %v1992_v13, %v1867_v11  ;;  %v1998_v18 = vmax.f32 %v1991_v52, 0.0 }
 0x9c4   : > { %v1994_v15 = vpop.f32.mrf.mxu1 }
 0x9c5   : > { %v1995_v16 = vadd.f32 %v1994_v15, %v1871_v10  ;;  %v1999_v17 = vmax.f32 %v1993_v14, 0.0 }
 0x9c7   : > { %v2000_v19 = vmax.f32 %v1995_v16, 0.0  ;;  %v2001_v22 = vpack.c.bf16 %v1999_v17, %v1997_v20 }
 0x9c9   : > { %v2002_v21 = vpack.c.bf16 %v2000_v19, %v1998_v18 }
 0x9cb   : > { %2167 = vmatprep.mubr.bf16.mxu0 %v2002_v21 }
 0x9cc   : > { %2168 = vmatmul.mubr.bf16.vlgmr.msra.gmra.mxu0 %v2001_v22 }
 0xa8c   : > { %v2654_v24 = vpop.f32.mrf.mxu0 }
 0xa8e   : > { %v2655_v26 = vpop.f32.mrf.mxu0 }
 0xa8f   : > { %v2656_v27 = vadd.f32 %v2655_v26, %v2654_v24 }
 0xa90   : > { %v2657_v28 = vpop.f32.mrf.mxu0 }
 0xa91   : > { %v2170_v29 = vadd.f32 %v2656_v27, %v2038_v25 }
 0xa92   : > { %v2658_v30 = vpop.f32.mrf.mxu0 }
 0xa93   : > { %v2659_v31 = vadd.f32 %v2658_v30, %v2657_v28  ;;  %v2176_v32 = vadd.f32 %v2170_v29, %v1843_v58 }
 0xa95   : > { %v2173_v33 = vadd.f32 %v2659_v31, %v2038_v25  ;;  %2178 = vadd.xlane.f32.xlu1 %v2176_v32 }
 0xa97   : > { %v2177_v34 = vadd.f32 %v2173_v33, %v1844_v59 }
 0xa99   : > { %2180 = vadd.xlane.f32.xlu0 %v2177_v34 }
 0xb1e   : > { %v2179_v35 = vpop.xlane.xlu1 %2178 }
 0xb1f   : > { %v2182_v36 = vmul.f32 0.0078125, %v2179_v35 }
 0xb21   : > { %v2184_v37 = vsub.f32 %v2176_v32, %v2182_v36 }
 0xb22   : > { %v2181_v38 = vpop.xlane.xlu0 %2180 }
 0xb23   : > { %v2183_v39 = vmul.f32 0.0078125, %v2181_v38  ;;  %v2186_v40 = vmul.f32 %v2184_v37, %v2184_v37 }
 0xb25   : > { %v2185_v41 = vsub.f32 %v2177_v34, %v2183_v39  ;;  %2188 = vadd.xlane.f32.xlu1 %v2186_v40 }
 0xb27   : > { %v2187_v42 = vmul.f32 %v2185_v41, %v2185_v41 }
 0xb29   : > { %2190 = vadd.xlane.f32.xlu0 %v2187_v42 }
 0xbae   : > { %v2189_v44 = vpop.xlane.xlu1 %2188 }
 0xbaf   : > { %v2192_v45 = vmul.f32 0.0078125, %v2189_v44 }
 0xbb1   : > { %v2194_v46 = vadd.f32 1e-05, %v2192_v45 }
 0xbb2   : > { %v2191_v43 = vpop.xlane.xlu0 %2190 }
 0xbb3   : > { %3136 = vrsqrt.f32 %v2194_v46  ;;  %v2193_v47 = vmul.f32 0.0078125, %v2191_v43 }
 0xbb5   : > { %v2195_v48 = vadd.f32 1e-05, %v2193_v47 }
 0xbb7   : > { %3138 = vrsqrt.f32 %v2195_v48 }
 0xbc0   : > { %v3137_v51 = vpop.eup %3136 }
 0xbc1   : > { %v2198_v55 = vmul.f32 %v3137_v51, %v2184_v37 }
 0xbc3   : > { %v2204_v56 = vmul.f32 %v2203_v50, %v2198_v55 }
 0xbc4   : > { %v3139_v57 = vpop.eup %3138 }
 0xbc5   : > { %v2199_v58 = vmul.f32 %v3139_v57, %v2185_v41  ;;  %v2210_v59 = vadd.f32 %v2209_v54, %v2204_v56 }
 0xbc7   : > { %v2205_v63 = vmul.f32 %v2203_v50, %v2199_v58  ;;  %2212 = vst [vmem:[%s3873_s10] sm:$0xff] %v2210_v59 }
 0xbc9   : > { %v2211_v0 = vadd.f32 %v2209_v54, %v2205_v63 }
 0xbcb   : > { %2213 = vst [vmem:[%s3873_s10 + $0x8] sm:$0xff] %v2211_v0 }
 0xbcc   : > { %3391 = shalt.err (!%p3388_p6)
}
 0xbcd   : > { %s3392_s26 = scalar_lea.hbm %s4075_s29, 256  ;;  %s3396_s22 = scalar_lea.hbm %s4218_s24, 1024 }
 0xbce   : > { %p3393_p12 = scmp.ne.s32.totalorder %s4075_s29, %s3392_s26  ;;  %p3397_p4 = scmp.lt.s32.totalorder %s4075_s29, %s4218_s24 }
 0xbcf   : > { %p3398_p7 = scmp.lt.s32.totalorder %s3396_s22, %s3392_s26 }
 0xbd0   : > { %p3394_p0 = pnand %p3393_p12, %p3780_p11 }
 0xbd1   : > { %p3399_p3 = por %p3398_p7, %p3397_p4 }
 0xbd2   : > { %p3395_p2 = pneg %p3394_p0 }
 0xbd4   : > { %p3400_p8 = pnand %p3399_p3, %p3395_p2 }
 0xbd6   : > { %3403 = shalt.err (!%p3400_p8)
}
 0xbd7   : > { %s3543_s28 = smov 128   ;;  %s3544_s2 = smov 8  }
 0xbd8   : > { %2836 = dma.vmem_to_hbm [thread:$0]  (%p3780_p11), %s4077_s20, 256, %s4075_s29, %s4082_s7, %s3543_s28, %s3543_s28, %s3544_s2  }
 0xbd9 PF: > { %p2886_p9 = scmp.ge.s32.totalorder %s3518_s23, 2  ;;  %s2245_s25 = sand.u32 1, %s3478_s13  }
 0xbda   : > { %s2246_s16 = scalar_lea.sflag [#allocation6], %s2245_s25 }
 0xbdb   : > { %p2868_p5 = pnand %p2886_p9, %p3793_p1 }
 0xbdd   : > { %p2869_p13 = pneg %p2868_p5 }
 0xbdf   : > { %3473 = dma.done.wait (%p2869_p13), %s2246_s16, 256  }
 0xbe0   : > { %3475 = vsyncadd (%p2869_p13), %s2246_s16, 4294967040  ;;  %s32_s23 = sadd.s32 1, %s3518_s23   ;;  %s4219_s30 = sld [smem:[#allocation34_spill]] }
 0xbe1   : > { %p29_p10 = scmp.ge.s32.totalorder %s32_s23, 6   ;;  %s4220_s20 = sld [smem:[#allocation29_spill]] }
 0xbe2   : > { %s4221_s9 = sld [smem:[#allocation30_spill]]  ;;  %s4224_s13 = smov %s3482_s14 }
 0xbe3   : > { %s4222_s21 = sld [smem:[#allocation32_spill]]  ;;  %s4225_s14 = smov %s3486_s15 }
 0xbe4   : > { %s4223_s22 = sld [smem:[#allocation33_spill]]  ;;  %s4226_s15 = smov %s3788_s19 }
 0xbe5   : > { %s4227_s16 = smov %s3494_s17  ;;  %s4228_s17 = smov %s3498_s18 }
 0xbe6   : > { %s4229_s18 = smov %s4219_s30  ;;  %31 = sbr.rel (!%p29_p10) target bundleno = 25 (0x19), region = 152 }
 0xbe7   : > { %s4230_s19 = smov %s4220_s20 }
 0xbe8   : > { %s4231_s20 = smov %s4221_s9 }
 0xbeb   :  { %2251 = vsyncpa [#allocation5], 1 }
 0xbec   :  { %2253 = vsyncpa [#allocation5 + $0x1], 1 }
 0xbed   :  { %2254 = vsyncpa [#allocation8], 1 }
 0xbee   :  { %2256 = vsyncpa [#allocation8 + $0x1], 1 }
 0xbef   :  { %2257 = vsyncpa [#allocation11], 1 }
 0xbf0   :  { %2258 = vsyncpa [#allocation14], 1 }
 0xbf1   :  { %2259 = vsyncpa [#allocation17], 1 }
 0xbf2   :  { %2260 = vsyncpa [#allocation6], 1 }
 0xbf3   :  { %2262 = vsyncpa [#allocation6 + $0x1], 1 }

</bundles_post_ra>
